<compile_context>
chip_gen: v6e
topology: v6e:2x2x1
jax: 0.10.0
libtpu: 0.0.40
codegen_flags: <defaults>
</compile_context>

<pallas_src>
import functools

import jax
import jax.numpy as jnp
from jax.experimental import pallas as pl
from jax.experimental.pallas import tpu as pltpu

LANE = 128
SUBLANE = 8
NEG_SLOPE = 0.01  # torch.nn.LeakyReLU default


def _round_up(n, m):
    return ((n + m - 1) // m) * m


# --------------------------------------------------------------------------- #
# Kernel
# --------------------------------------------------------------------------- #
def triple_net_kernel(x_ref, w1_ref, w2_ref, w3_ref, w4_ref, misc_ref, o_ref):
    """Fused forward over one batch tile.

    x_ref   : (TB, in_pad)  f32 or bf16 (cast to bf16 in-kernel)
    w1..w3  : padded, BN-folded weights, bf16
    w4_ref  : (k_pad, 128)  bf16, column 0 = final-layer weight, rest zeros
    misc_ref: (8, k_pad)    f32; rows 0..2 = folded biases b*s + t, [3, 0] = b4
    o_ref   : (1, TB//128, 128) f32, lane-dense output (row-major over the tile)
    """

    def block(h_bf16, w_ref, row):
        z = jnp.dot(h_bf16, w_ref[...], preferred_element_type=jnp.float32)  # MXU
        z = z + misc_ref[pl.ds(row, 1), :]              # folded Linear bias + BN
        z = jnp.where(z >= 0, z, NEG_SLOPE * z)         # LeakyReLU (Dropout = id)
        return z.astype(jnp.bfloat16)

    h = block(x_ref[...].astype(jnp.bfloat16), w1_ref, 0)
    h = block(h, w2_ref, 1)
    h = block(h, w3_ref, 2)

    # Final Linear(K, 1) on the MXU. Only column 0 of w4_ref is non-zero, so the
    # lane-sum below just collects that column while laying the result out
    # lane-dense as (TB//128, 128).
    m = jnp.dot(h, w4_ref[...], preferred_element_type=jnp.float32)   # (TB, 128)
    tb = m.shape[0]
    p = tb // LANE
    out = jnp.sum(m.reshape(p, LANE, LANE), axis=-1)                  # (P, 128)
    out = out + misc_ref[pl.ds(3, 1), pl.ds(0, 1)]                    # + b4
    o_ref[...] = out.reshape(o_ref.shape).astype(o_ref.dtype)


# --------------------------------------------------------------------------- #
# Parameter construction (PyTorch-style init) and kernel-side packing
# --------------------------------------------------------------------------- #
def make_params(key, input_size, K):
    """Deterministic init mirroring Triple_Net.__init__ (eval mode)."""

    def linear(key, fan_in, fan_out):
        kw, kb = jax.random.split(key)
        bound = 1.0 / jnp.sqrt(jnp.asarray(fan_in, jnp.float32))
        w = jax.random.uniform(kw, (fan_in, fan_out), jnp.float32, -bound, bound)
        b = jax.random.uniform(kb, (fan_out,), jnp.float32, -bound, bound)
        return w, b

    def bn_affine(feats, eps=1e-5):
        gamma = jnp.ones((feats,), jnp.float32)
        beta = jnp.zeros((feats,), jnp.float32)
        running_mean = jnp.zeros((feats,), jnp.float32)
        running_var = jnp.ones((feats,), jnp.float32)
        scale = gamma / jnp.sqrt(running_var + eps)
        shift = beta - running_mean * scale
        return scale, shift

    k1, k2, k3, k4 = jax.random.split(key, 4)
    w1, b1 = linear(k1, input_size, K)
    w2, b2 = linear(k2, K, K)
    w3, b3 = linear(k3, K, K)
    w4, b4 = linear(k4, K, 1)
    bn = [bn_affine(K) for _ in range(3)]
    return dict(w=[w1, w2, w3], b=[b1, b2, b3], bn=bn, w4=w4, b4=b4)


def prepare_kernel_params(params, input_size, K):
    """Fold bias + BN into weights, zero-pad to 128 lanes, cast weights to bf16.

    Returns (w1, w2, w3, w4blk, misc):
      w1 (in_pad, k_pad) / w2, w3 (k_pad, k_pad)  bf16 BN-folded weights
      w4blk (k_pad, 128) bf16, column 0 = final-layer weight
      misc (8, k_pad) f32: rows 0..2 = folded biases, [3, 0] = final bias b4
    """
    in_pad = _round_up(input_size, LANE)
    k_pad = _round_up(K, LANE)

    folded_w, folded_b = [], []
    for i in range(3):
        s, t = params["bn"][i]
        folded_w.append(params["w"][i] * s[None, :])        # W' = W * s
        folded_b.append(params["b"][i] * s + t)             # b' = b*s + t

    def pad2(a, rows, cols):
        return jnp.zeros((rows, cols), jnp.float32).at[: a.shape[0], : a.shape[1]].set(a)

    w1 = pad2(folded_w[0], in_pad, k_pad).astype(jnp.bfloat16)
    w2 = pad2(folded_w[1], k_pad, k_pad).astype(jnp.bfloat16)
    w3 = pad2(folded_w[2], k_pad, k_pad).astype(jnp.bfloat16)
    w4blk = pad2(params["w4"], k_pad, LANE).astype(jnp.bfloat16)   # col 0 = w4

    misc = jnp.zeros((SUBLANE, k_pad), jnp.float32)
    misc = misc.at[0, :K].set(folded_b[0])
    misc = misc.at[1, :K].set(folded_b[1])
    misc = misc.at[2, :K].set(folded_b[2])
    misc = misc.at[3, 0].set(params["b4"][0])
    return w1, w2, w3, w4blk, misc


# --------------------------------------------------------------------------- #
# pallas_call wrapper
# --------------------------------------------------------------------------- #
def _pick_batch_tile(B):
    """Multiple of 128, <=1024 rows, and >=2 grid steps when B allows (v7x)."""
    if B <= LANE:
        return LANE
    tb = _round_up((B + 1) // 2, LANE)
    return max(LANE, min(1024, tb))


def _vmem_limit_bytes(need_bytes):
    """Generation-aware VMEM budget: actual need + headroom, capped at 3/4 cap."""
    try:
        info = pltpu.get_tpu_info()
        cap = int(getattr(info, "vmem_capacity_bytes", 0)
                  or getattr(info, "vmem_size_bytes", 0) or (64 << 20))
    except Exception:
        cap = 64 << 20  # conservative default (v7x per-TensorCore VMEM)
    return int(min(cap * 3 // 4, max(need_bytes + (16 << 20), 32 << 20)))


@functools.partial(jax.jit, static_argnames=("single_buffer_weights",))
def _forward(x, w1, w2, w3, w4blk, misc, *, single_buffer_weights=True):
    B, in_features = x.shape
    in_pad, k_pad = w1.shape

    TB = _pick_batch_tile(B)
    b_pad = _round_up(B, TB)
    P = TB // LANE

    if B == b_pad and in_features == in_pad:
        xk = x                       # zero-copy fast path; kernel casts f32->bf16
    else:
        # Ragged shapes: single pad copy (bf16 to halve the kernel-side read).
        xk = jnp.zeros((b_pad, in_pad), jnp.bfloat16)
        xk = xk.at[:B, :in_features].set(x.astype(jnp.bfloat16))

    resident = (w1.size + w2.size + w3.size + w4blk.size) * 2 + misc.size * 4
    x_tile = TB * in_pad * xk.dtype.itemsize
    out_tile = P * LANE * 4
    vmem_limit = _vmem_limit_bytes(resident + 2 * (x_tile + out_tile))

    weight_kw = {"pipeline_mode": pl.Buffered(1)} if single_buffer_weights else {}

    flops = 2 * b_pad * (in_pad * k_pad + 2 * k_pad * k_pad + k_pad * LANE)
    bytes_accessed = xk.size * xk.dtype.itemsize + resident + b_pad * LANE * 4

    out = pl.pallas_call(
        triple_net_kernel,
        out_shape=jax.ShapeDtypeStruct((b_pad // TB, P, LANE), jnp.float32),
        grid=(b_pad // TB,),
        in_specs=[
            pl.BlockSpec((TB, in_pad), lambda i: (i, 0)),          # x: pipelined
            pl.BlockSpec(w1.shape, lambda i: (0, 0), **weight_kw),  # weights: resident
            pl.BlockSpec(w2.shape, lambda i: (0, 0), **weight_kw),
            pl.BlockSpec(w3.shape, lambda i: (0, 0), **weight_kw),
            pl.BlockSpec(w4blk.shape, lambda i: (0, 0), **weight_kw),
            pl.BlockSpec(misc.shape, lambda i: (0, 0), **weight_kw),
        ],
        out_specs=pl.BlockSpec((1, P, LANE), lambda i: (i, 0, 0)),  # lane-dense
        compiler_params=pltpu.CompilerParams(
            dimension_semantics=("parallel",),
            vmem_limit_bytes=vmem_limit,
        ),
        cost_estimate=pl.CostEstimate(
            flops=flops, transcendentals=0, bytes_accessed=bytes_accessed),
    )(xk, w1, w2, w3, w4blk, misc)

    # Row-major flatten maps (tile, p, lane) -> batch row; drop padded rows.
    return out.reshape(-1)[:B].reshape(B, 1)


def triple_net_forward(x, w1, w2, w3, w4blk, misc):
    try:
        return _forward(x, w1, w2, w3, w4blk, misc, single_buffer_weights=True)
    except Exception:
        # Fallback for Pallas versions without pipeline_mode / Buffered(1).
        return _forward(x, w1, w2, w3, w4blk, misc, single_buffer_weights=False)


# --------------------------------------------------------------------------- #
# References
# --------------------------------------------------------------------------- #
def reference_forward_f32(x, params):
    """Pure f32 reference matching the PyTorch module in eval mode."""
    h = x
    for i in range(3):
        w, b = params["w"][i], params["b"][i]
        s, t = params["bn"][i]
        z = h @ w + b[None, :]
        z = z * s[None, :] + t[None, :]
        h = jnp.where(z >= 0, z, NEG_SLOPE * z)
    return h @ params["w4"] + params["b4"][None, :]


def reference_forward_bf16(x, w1, w2, w3, w4blk, misc, input_size):
    """Mimics the kernel's bf16/f32 mixed precision for a tight check."""
    in_pad, _ = w1.shape
    h = jnp.zeros((x.shape[0], in_pad), jnp.float32).at[:, :input_size].set(x)
    h = h.astype(jnp.bfloat16)
    for row, w in enumerate((w1, w2, w3)):
        z = jnp.dot(h, w, preferred_element_type=jnp.float32)
        z = z + misc[row][None, :]
        z = jnp.where(z >= 0, z, NEG_SLOPE * z)
        h = z.astype(jnp.bfloat16)
    m = jnp.dot(h, w4blk, preferred_element_type=jnp.float32)
    return m[:, 0:1] + misc[3, 0]


if __name__ == "__main__":
    batch = 8
    input_size = 32
    K = 32

    key = jax.random.PRNGKey(0)
    kx, kp = jax.random.split(key)
    x = jax.random.normal(kx, (batch, input_size), jnp.float32)

    params = make_params(kp, input_size, K)
    w1, w2, w3, w4blk, misc = prepare_kernel_params(params, input_size, K)

    out = jax.block_until_ready(triple_net_forward(x, w1, w2, w3, w4blk, misc))
    assert out.shape == (batch, 1), out.shape

    ref_bf16 = reference_forward_bf16(x, w1, w2, w3, w4blk, misc, input_size)
    ref_f32 = reference_forward_f32(x, params)
    assert jnp.allclose(out, ref_bf16, atol=2e-3, rtol=2e-3), "mismatch vs bf16 reference"
    assert jnp.allclose(out, ref_f32, atol=5e-2, rtol=5e-2), "mismatch vs f32 reference"

    print("KERNEL_OK")
</pallas_src>

<mosaic_0001>
module attributes {stable_mosaic.version = 11 : i64} {
  func.func @triple_net_kernel(%arg0: i32, %arg1: memref<128x128xbf16, #tpu.memory_space<vmem>>, %arg2: memref<128x128xbf16, #tpu.memory_space<vmem>>, %arg3: memref<128x128xbf16, #tpu.memory_space<vmem>>, %arg4: memref<128x128xbf16, #tpu.memory_space<vmem>>, %arg5: memref<128x128xbf16, #tpu.memory_space<vmem>>, %arg6: memref<8x128xf32, #tpu.memory_space<vmem>>, %arg7: memref<1x1x128xf32, #tpu.memory_space<vmem>>) attributes {dimension_semantics = [#tpu.dimension_semantics<parallel>], iteration_bounds = array<i64: 1>, scalar_prefetch = 0 : i64, scratch_operands = 0 : i64, tpu.core_type = #tpu.core_type<tc>, window_params = [{transform_indices = @transform_0, window_bounds = array<i64: 128, 128>}, {pipeline_mode = #tpu.pipeline_mode<synchronous>, transform_indices = @transform_1, window_bounds = array<i64: 128, 128>}, {pipeline_mode = #tpu.pipeline_mode<synchronous>, transform_indices = @transform_2, window_bounds = array<i64: 128, 128>}, {pipeline_mode = #tpu.pipeline_mode<synchronous>, transform_indices = @transform_3, window_bounds = array<i64: 128, 128>}, {pipeline_mode = #tpu.pipeline_mode<synchronous>, transform_indices = @transform_4, window_bounds = array<i64: 128, 128>}, {pipeline_mode = #tpu.pipeline_mode<synchronous>, transform_indices = @transform_5, window_bounds = array<i64: 8, 128>}, {transform_indices = @transform_6, window_bounds = array<i64: 1, 1, 128>}]} {
    %c0 = arith.constant 0 : index
    %c0_0 = arith.constant 0 : index
    %0 = vector.load %arg1[%c0, %c0_0] : memref<128x128xbf16, #tpu.memory_space<vmem>>, vector<128x128xbf16>
    %c0_1 = arith.constant 0 : index
    %c0_2 = arith.constant 0 : index
    %1 = vector.load %arg2[%c0_1, %c0_2] : memref<128x128xbf16, #tpu.memory_space<vmem>>, vector<128x128xbf16>
    %cst = arith.constant dense<0.000000e+00> : vector<128x128xf32>
    %2 = tpu.matmul %0, %1, %cst {dimension_numbers = #tpu.dot_dimension_numbers<[1], [0], [0], [1], [0, 0, 1, 1], [], []>} : vector<128x128xbf16>, vector<128x128xbf16>, vector<128x128xf32> -> vector<128x128xf32>
    %c0_3 = arith.constant 0 : index
    %c0_4 = arith.constant 0 : index
    %3 = vector.load %arg6[%c0_3, %c0_4] : memref<8x128xf32, #tpu.memory_space<vmem>>, vector<1x128xf32>
    %4 = vector.broadcast %3 : vector<1x128xf32> to vector<128x128xf32>
    %5 = arith.addf %2, %4 : vector<128x128xf32>
    %cst_5 = arith.constant 0.000000e+00 : f32
    %6 = vector.broadcast %cst_5 : f32 to vector<128x128xf32>
    %7 = arith.cmpf oge, %5, %6 : vector<128x128xf32>
    %cst_6 = arith.constant 0.00999999977 : f32
    %8 = vector.broadcast %cst_6 : f32 to vector<128x128xf32>
    %9 = arith.mulf %8, %5 : vector<128x128xf32>
    %10 = arith.select %7, %5, %9 : vector<128x128xi1>, vector<128x128xf32>
    %11 = arith.truncf %10 : vector<128x128xf32> to vector<128x128xbf16>
    %c0_7 = arith.constant 0 : index
    %c0_8 = arith.constant 0 : index
    %12 = vector.load %arg3[%c0_7, %c0_8] : memref<128x128xbf16, #tpu.memory_space<vmem>>, vector<128x128xbf16>
    %cst_9 = arith.constant dense<0.000000e+00> : vector<128x128xf32>
    %13 = tpu.matmul %11, %12, %cst_9 {dimension_numbers = #tpu.dot_dimension_numbers<[1], [0], [0], [1], [0, 0, 1, 1], [], []>} : vector<128x128xbf16>, vector<128x128xbf16>, vector<128x128xf32> -> vector<128x128xf32>
    %c1 = arith.constant 1 : index
    %c0_10 = arith.constant 0 : index
    %14 = vector.load %arg6[%c1, %c0_10] : memref<8x128xf32, #tpu.memory_space<vmem>>, vector<1x128xf32>
    %15 = vector.broadcast %14 : vector<1x128xf32> to vector<128x128xf32>
    %16 = arith.addf %13, %15 : vector<128x128xf32>
    %cst_11 = arith.constant 0.000000e+00 : f32
    %17 = vector.broadcast %cst_11 : f32 to vector<128x128xf32>
    %18 = arith.cmpf oge, %16, %17 : vector<128x128xf32>
    %cst_12 = arith.constant 0.00999999977 : f32
    %19 = vector.broadcast %cst_12 : f32 to vector<128x128xf32>
    %20 = arith.mulf %19, %16 : vector<128x128xf32>
    %21 = arith.select %18, %16, %20 : vector<128x128xi1>, vector<128x128xf32>
    %22 = arith.truncf %21 : vector<128x128xf32> to vector<128x128xbf16>
    %c0_13 = arith.constant 0 : index
    %c0_14 = arith.constant 0 : index
    %23 = vector.load %arg4[%c0_13, %c0_14] : memref<128x128xbf16, #tpu.memory_space<vmem>>, vector<128x128xbf16>
    %cst_15 = arith.constant dense<0.000000e+00> : vector<128x128xf32>
    %24 = tpu.matmul %22, %23, %cst_15 {dimension_numbers = #tpu.dot_dimension_numbers<[1], [0], [0], [1], [0, 0, 1, 1], [], []>} : vector<128x128xbf16>, vector<128x128xbf16>, vector<128x128xf32> -> vector<128x128xf32>
    %c2 = arith.constant 2 : index
    %c0_16 = arith.constant 0 : index
    %25 = vector.load %arg6[%c2, %c0_16] : memref<8x128xf32, #tpu.memory_space<vmem>>, vector<1x128xf32>
    %26 = vector.broadcast %25 : vector<1x128xf32> to vector<128x128xf32>
    %27 = arith.addf %24, %26 : vector<128x128xf32>
    %cst_17 = arith.constant 0.000000e+00 : f32
    %28 = vector.broadcast %cst_17 : f32 to vector<128x128xf32>
    %29 = arith.cmpf oge, %27, %28 : vector<128x128xf32>
    %cst_18 = arith.constant 0.00999999977 : f32
    %30 = vector.broadcast %cst_18 : f32 to vector<128x128xf32>
    %31 = arith.mulf %30, %27 : vector<128x128xf32>
    %32 = arith.select %29, %27, %31 : vector<128x128xi1>, vector<128x128xf32>
    %33 = arith.truncf %32 : vector<128x128xf32> to vector<128x128xbf16>
    %c0_19 = arith.constant 0 : index
    %c0_20 = arith.constant 0 : index
    %34 = vector.load %arg5[%c0_19, %c0_20] : memref<128x128xbf16, #tpu.memory_space<vmem>>, vector<128x128xbf16>
    %cst_21 = arith.constant dense<0.000000e+00> : vector<128x128xf32>
    %35 = tpu.matmul %33, %34, %cst_21 {dimension_numbers = #tpu.dot_dimension_numbers<[1], [0], [0], [1], [0, 0, 1, 1], [], []>} : vector<128x128xbf16>, vector<128x128xbf16>, vector<128x128xf32> -> vector<128x128xf32>
    %36 = vector.shape_cast %35 : vector<128x128xf32> to vector<1x128x128xf32>
    %cst_22 = arith.constant dense<0.000000e+00> : vector<1x128xf32>
    %37 = vector.multi_reduction <add>, %36, %cst_22 [2] : vector<1x128x128xf32> to vector<1x128xf32>
    %c3 = arith.constant 3 : index
    %c0_23 = arith.constant 0 : index
    %38 = vector.load %arg6[%c3, %c0_23] : memref<8x128xf32, #tpu.memory_space<vmem>>, vector<1x1xf32>
    %39 = vector.broadcast %38 : vector<1x1xf32> to vector<1x128xf32>
    %40 = arith.addf %37, %39 : vector<1x128xf32>
    %41 = vector.shape_cast %40 : vector<1x128xf32> to vector<1x1x128xf32>
    %c0_24 = arith.constant 0 : index
    %c0_25 = arith.constant 0 : index
    %c0_26 = arith.constant 0 : index
    %42 = vector.load %arg7[%c0_24, %c0_25, %c0_26] : memref<1x1x128xf32, #tpu.memory_space<vmem>>, vector<1x1x128xf32>
    tpu.vector_store %arg7[%c0_24, %c0_25, %c0_26], %41 {strides = array<i32>} : memref<1x1x128xf32, #tpu.memory_space<vmem>>, vector<1x1x128xf32>,
    return
  }
  func.func @transform_0(%arg0: i32) -> (i32, i32) {
    %c0_i32 = arith.constant 0 : i32
    %c0_i32_0 = arith.constant 0 : i32
    return %arg0, %c0_i32 : i32, i32
  }
  func.func @transform_1(%arg0: i32) -> (i32, i32) {
    %c0_i32 = arith.constant 0 : i32
    %c0_i32_0 = arith.constant 0 : i32
    %c0_i32_1 = arith.constant 0 : i32
    return %c0_i32, %c0_i32_0 : i32, i32
  }
  func.func @transform_2(%arg0: i32) -> (i32, i32) {
    %c0_i32 = arith.constant 0 : i32
    %c0_i32_0 = arith.constant 0 : i32
    %c0_i32_1 = arith.constant 0 : i32
    return %c0_i32, %c0_i32_0 : i32, i32
  }
  func.func @transform_3(%arg0: i32) -> (i32, i32) {
    %c0_i32 = arith.constant 0 : i32
    %c0_i32_0 = arith.constant 0 : i32
    %c0_i32_1 = arith.constant 0 : i32
    return %c0_i32, %c0_i32_0 : i32, i32
  }
  func.func @transform_4(%arg0: i32) -> (i32, i32) {
    %c0_i32 = arith.constant 0 : i32
    %c0_i32_0 = arith.constant 0 : i32
    %c0_i32_1 = arith.constant 0 : i32
    return %c0_i32, %c0_i32_0 : i32, i32
  }
  func.func @transform_5(%arg0: i32) -> (i32, i32) {
    %c0_i32 = arith.constant 0 : i32
    %c0_i32_0 = arith.constant 0 : i32
    %c0_i32_1 = arith.constant 0 : i32
    return %c0_i32, %c0_i32_0 : i32, i32
  }
  func.func @transform_6(%arg0: i32) -> (i32, i32, i32) {
    %c0_i32 = arith.constant 0 : i32
    %c0_i32_0 = arith.constant 0 : i32
    %c0_i32_1 = arith.constant 0 : i32
    return %arg0, %c0_i32, %c0_i32_0 : i32, i32, i32
  }
}

module attributes {stable_mosaic.version = 11 : i64} {
  func.func @triple_net_kernel(%arg0: i32, %arg1: memref<128x128xbf16, #tpu.memory_space<vmem>>, %arg2: memref<128x128xbf16, #tpu.memory_space<vmem>>, %arg3: memref<128x128xbf16, #tpu.memory_space<vmem>>, %arg4: memref<128x128xbf16, #tpu.memory_space<vmem>>, %arg5: memref<128x128xbf16, #tpu.memory_space<vmem>>, %arg6: memref<8x128xf32, #tpu.memory_space<vmem>>, %arg7: memref<1x1x128xf32, #tpu.memory_space<vmem>>) attributes {dimension_semantics = [#tpu.dimension_semantics<parallel>], iteration_bounds = array<i64: 1>, scalar_prefetch = 0 : i64, scratch_operands = 0 : i64, tpu.core_type = #tpu.core_type<tc>, window_params = [{transform_indices = @transform_0, window_bounds = array<i64: 128, 128>}, {pipeline_mode = #tpu.pipeline_mode<synchronous>, transform_indices = @transform_1, window_bounds = array<i64: 128, 128>}, {pipeline_mode = #tpu.pipeline_mode<synchronous>, transform_indices = @transform_2, window_bounds = array<i64: 128, 128>}, {pipeline_mode = #tpu.pipeline_mode<synchronous>, transform_indices = @transform_3, window_bounds = array<i64: 128, 128>}, {pipeline_mode = #tpu.pipeline_mode<synchronous>, transform_indices = @transform_4, window_bounds = array<i64: 128, 128>}, {pipeline_mode = #tpu.pipeline_mode<synchronous>, transform_indices = @transform_5, window_bounds = array<i64: 8, 128>}, {transform_indices = @transform_6, window_bounds = array<i64: 1, 1, 128>}]} {
    %c0 = arith.constant 0 : index
    %c0_0 = arith.constant 0 : index
    %0 = vector.load %arg1[%c0, %c0_0] : memref<128x128xbf16, #tpu.memory_space<vmem>>, vector<128x128xbf16>
    %c0_1 = arith.constant 0 : index
    %c0_2 = arith.constant 0 : index
    %1 = vector.load %arg2[%c0_1, %c0_2] : memref<128x128xbf16, #tpu.memory_space<vmem>>, vector<128x128xbf16>
    %cst = arith.constant dense<0.000000e+00> : vector<128x128xf32>
    %2 = tpu.matmul %0, %1, %cst {dimension_numbers = #tpu.dot_dimension_numbers<[1], [0], [0], [1], [0, 0, 1, 1], [], []>} : vector<128x128xbf16>, vector<128x128xbf16>, vector<128x128xf32> -> vector<128x128xf32>
    %c0_3 = arith.constant 0 : index
    %c0_4 = arith.constant 0 : index
    %3 = vector.load %arg6[%c0_3, %c0_4] : memref<8x128xf32, #tpu.memory_space<vmem>>, vector<1x128xf32>
    %4 = vector.broadcast %3 : vector<1x128xf32> to vector<128x128xf32>
    %5 = arith.addf %2, %4 : vector<128x128xf32>
    %cst_5 = arith.constant 0.000000e+00 : f32
    %6 = vector.broadcast %cst_5 : f32 to vector<128x128xf32>
    %7 = arith.cmpf oge, %5, %6 : vector<128x128xf32>
    %cst_6 = arith.constant 0.00999999977 : f32
    %8 = vector.broadcast %cst_6 : f32 to vector<128x128xf32>
    %9 = arith.mulf %8, %5 : vector<128x128xf32>
    %10 = arith.select %7, %5, %9 : vector<128x128xi1>, vector<128x128xf32>
    %11 = arith.truncf %10 : vector<128x128xf32> to vector<128x128xbf16>
    %c0_7 = arith.constant 0 : index
    %c0_8 = arith.constant 0 : index
    %12 = vector.load %arg3[%c0_7, %c0_8] : memref<128x128xbf16, #tpu.memory_space<vmem>>, vector<128x128xbf16>
    %cst_9 = arith.constant dense<0.000000e+00> : vector<128x128xf32>
    %13 = tpu.matmul %11, %12, %cst_9 {dimension_numbers = #tpu.dot_dimension_numbers<[1], [0], [0], [1], [0, 0, 1, 1], [], []>} : vector<128x128xbf16>, vector<128x128xbf16>, vector<128x128xf32> -> vector<128x128xf32>
    %c1 = arith.constant 1 : index
    %c0_10 = arith.constant 0 : index
    %14 = vector.load %arg6[%c1, %c0_10] : memref<8x128xf32, #tpu.memory_space<vmem>>, vector<1x128xf32>
    %15 = vector.broadcast %14 : vector<1x128xf32> to vector<128x128xf32>
    %16 = arith.addf %13, %15 : vector<128x128xf32>
    %cst_11 = arith.constant 0.000000e+00 : f32
    %17 = vector.broadcast %cst_11 : f32 to vector<128x128xf32>
    %18 = arith.cmpf oge, %16, %17 : vector<128x128xf32>
    %cst_12 = arith.constant 0.00999999977 : f32
    %19 = vector.broadcast %cst_12 : f32 to vector<128x128xf32>
    %20 = arith.mulf %19, %16 : vector<128x128xf32>
    %21 = arith.select %18, %16, %20 : vector<128x128xi1>, vector<128x128xf32>
    %22 = arith.truncf %21 : vector<128x128xf32> to vector<128x128xbf16>
    %c0_13 = arith.constant 0 : index
    %c0_14 = arith.constant 0 : index
    %23 = vector.load %arg4[%c0_13, %c0_14] : memref<128x128xbf16, #tpu.memory_space<vmem>>, vector<128x128xbf16>
    %cst_15 = arith.constant dense<0.000000e+00> : vector<128x128xf32>
    %24 = tpu.matmul %22, %23, %cst_15 {dimension_numbers = #tpu.dot_dimension_numbers<[1], [0], [0], [1], [0, 0, 1, 1], [], []>} : vector<128x128xbf16>, vector<128x128xbf16>, vector<128x128xf32> -> vector<128x128xf32>
    %c2 = arith.constant 2 : index
    %c0_16 = arith.constant 0 : index
    %25 = vector.load %arg6[%c2, %c0_16] : memref<8x128xf32, #tpu.memory_space<vmem>>, vector<1x128xf32>
    %26 = vector.broadcast %25 : vector<1x128xf32> to vector<128x128xf32>
    %27 = arith.addf %24, %26 : vector<128x128xf32>
    %cst_17 = arith.constant 0.000000e+00 : f32
    %28 = vector.broadcast %cst_17 : f32 to vector<128x128xf32>
    %29 = arith.cmpf oge, %27, %28 : vector<128x128xf32>
    %cst_18 = arith.constant 0.00999999977 : f32
    %30 = vector.broadcast %cst_18 : f32 to vector<128x128xf32>
    %31 = arith.mulf %30, %27 : vector<128x128xf32>
    %32 = arith.select %29, %27, %31 : vector<128x128xi1>, vector<128x128xf32>
    %33 = arith.truncf %32 : vector<128x128xf32> to vector<128x128xbf16>
    %c0_19 = arith.constant 0 : index
    %c0_20 = arith.constant 0 : index
    %34 = vector.load %arg5[%c0_19, %c0_20] : memref<128x128xbf16, #tpu.memory_space<vmem>>, vector<128x128xbf16>
    %cst_21 = arith.constant dense<0.000000e+00> : vector<128x128xf32>
    %35 = tpu.matmul %33, %34, %cst_21 {dimension_numbers = #tpu.dot_dimension_numbers<[1], [0], [0], [1], [0, 0, 1, 1], [], []>} : vector<128x128xbf16>, vector<128x128xbf16>, vector<128x128xf32> -> vector<128x128xf32>
    %36 = vector.shape_cast %35 : vector<128x128xf32> to vector<1x128x128xf32>
    %cst_22 = arith.constant dense<0.000000e+00> : vector<1x128xf32>
    %37 = vector.multi_reduction <add>, %36, %cst_22 [2] : vector<1x128x128xf32> to vector<1x128xf32>
    %c3 = arith.constant 3 : index
    %c0_23 = arith.constant 0 : index
    %38 = vector.load %arg6[%c3, %c0_23] : memref<8x128xf32, #tpu.memory_space<vmem>>, vector<1x1xf32>
    %39 = vector.broadcast %38 : vector<1x1xf32> to vector<1x128xf32>
    %40 = arith.addf %37, %39 : vector<1x128xf32>
    %41 = vector.shape_cast %40 : vector<1x128xf32> to vector<1x1x128xf32>
    %c0_24 = arith.constant 0 : index
    %c0_25 = arith.constant 0 : index
    %c0_26 = arith.constant 0 : index
    %42 = vector.load %arg7[%c0_24, %c0_25, %c0_26] : memref<1x1x128xf32, #tpu.memory_space<vmem>>, vector<1x1x128xf32>
    tpu.vector_store %arg7[%c0_24, %c0_25, %c0_26], %41 {strides = array<i32>} : memref<1x1x128xf32, #tpu.memory_space<vmem>>, vector<1x1x128xf32>,
    return
  }
  func.func @transform_0(%arg0: i32) -> (i32, i32) {
    %c0_i32 = arith.constant 0 : i32
    %c0_i32_0 = arith.constant 0 : i32
    return %arg0, %c0_i32 : i32, i32
  }
  func.func @transform_1(%arg0: i32) -> (i32, i32) {
    %c0_i32 = arith.constant 0 : i32
    %c0_i32_0 = arith.constant 0 : i32
    %c0_i32_1 = arith.constant 0 : i32
    return %c0_i32, %c0_i32_0 : i32, i32
  }
  func.func @transform_2(%arg0: i32) -> (i32, i32) {
    %c0_i32 = arith.constant 0 : i32
    %c0_i32_0 = arith.constant 0 : i32
    %c0_i32_1 = arith.constant 0 : i32
    return %c0_i32, %c0_i32_0 : i32, i32
  }
  func.func @transform_3(%arg0: i32) -> (i32, i32) {
    %c0_i32 = arith.constant 0 : i32
    %c0_i32_0 = arith.constant 0 : i32
    %c0_i32_1 = arith.constant 0 : i32
    return %c0_i32, %c0_i32_0 : i32, i32
  }
  func.func @transform_4(%arg0: i32) -> (i32, i32) {
    %c0_i32 = arith.constant 0 : i32
    %c0_i32_0 = arith.constant 0 : i32
    %c0_i32_1 = arith.constant 0 : i32
    return %c0_i32, %c0_i32_0 : i32, i32
  }
  func.func @transform_5(%arg0: i32) -> (i32, i32) {
    %c0_i32 = arith.constant 0 : i32
    %c0_i32_0 = arith.constant 0 : i32
    %c0_i32_1 = arith.constant 0 : i32
    return %c0_i32, %c0_i32_0 : i32, i32
  }
  func.func @transform_6(%arg0: i32) -> (i32, i32, i32) {
    %c0_i32 = arith.constant 0 : i32
    %c0_i32_0 = arith.constant 0 : i32
    %c0_i32_1 = arith.constant 0 : i32
    return %arg0, %c0_i32, %c0_i32_0 : i32, i32, i32
  }
}

</mosaic_0001>

<bundles_post_ra>
// kernel: _forward.1
= control target key start
LH: loop header
LB: loop body
LE: loop exit
PB: predicated region body
PF: predicated region fallthrough
CT: control target
= control target key end

     0   :  { %11 = vsyncpa [#allocation3], 0  ;;  %s1748_s0 = inlined_call_operand.vmem [shape: bf16[128,128], index: 0, kind: input, shape index: {}]   ;;  %s1749_s1 = inlined_call_operand.vmem [shape: bf16[128,128], index: 1, kind: input, shape index: {}]   ;;  %s1750_s2 = inlined_call_operand.hbm [shape: bf16[128,128], index: 2, kind: input, shape index: {}]   ;;  %s1751_s3 = inlined_call_operand.hbm [shape: bf16[128,128], index: 3, kind: input, shape index: {}]   ;;  %s1752_s4 = inlined_call_operand.hbm [shape: bf16[128,128], index: 4, kind: input, shape index: {}]   ;;  %s1753_s5 = inlined_call_operand.vmem [shape: f32[8,128], index: 5, kind: input, shape index: {}]   ;;  %s1754_s6 = inlined_call_operand.vmem [shape: f32[1,1,128], index: 6, kind: output, shape index: {}]  }
   0x1   :  { %12 = vsyncpa [#allocation5], 0  ;;  %s1544_s21 = smov [#allocation4]   ;;  %s1545_s23 = smov [#allocation2]  }
   0x2   :  { %s34_s22 = sshll.u32 %s1544_s21, 4  ;;  %s22_s24 = sshll.u32 %s1545_s23, 4  ;;  %s35_s22 = int_to_ptr.vmem [resolvable:$true] %s34_s22  ;;  %s23_s24 = int_to_ptr.vmem [resolvable:$true] %s22_s24 }
   0x3   :  { %s1488_s25 = scalar_lea.vmem %s35_s22, 1024  ;;  %p1493_p1 = scmp.lt.s32.totalorder %s35_s22, %s35_s22 }
   0x4   :  { %p1489_p0 = scmp.ne.s32.totalorder %s35_s22, %s1488_s25  ;;  %p1494_p2 = scmp.lt.s32.totalorder %s1488_s25, %s1488_s25 }
   0x6   :  { %p1495_p3 = por %p1494_p2, %p1493_p1 }
   0x8   :  { %p1496_p4 = pnand %p1495_p3, %p1489_p0 }
   0xa   :  { %1499 = shalt.err (!%p1496_p4)
}
   0xb   :  { %s1546_s26 = smov 64   ;;  %s1547_s27 = smov 4  }
   0xc   :  { %40 = dma.hbm_to_vmem [thread:$0]  %s1751_s3, 1024, %s35_s22, [#allocation5], %s1546_s26, %s1546_s26, %s1547_s27  }
   0xd   :  { %s1508_s30 = scalar_lea.vmem %s23_s24, 1024  ;;  %p1513_p6 = scmp.lt.s32.totalorder %s23_s24, %s23_s24 }
   0xe   :  { %p1509_p5 = scmp.ne.s32.totalorder %s23_s24, %s1508_s30  ;;  %p1514_p7 = scmp.lt.s32.totalorder %s1508_s30, %s1508_s30 }
  0x10   :  { %p1515_p8 = por %p1514_p7, %p1513_p6 }
  0x12   :  { %p1516_p9 = pnand %p1515_p8, %p1509_p5 }
  0x14   :  { %1519 = shalt.err (!%p1516_p9)
}
  0x15   :  { %28 = dma.hbm_to_vmem [thread:$0]  %s1750_s2, 1024, %s23_s24, [#allocation3], %s1546_s26, %s1546_s26, %s1547_s27  }
  0x16   :  { %s1548_s9 = smov [#allocation6]  }
  0x17   :  { %s46_s10 = sshll.u32 %s1548_s9, 4  ;;  %s47_s10 = int_to_ptr.vmem [resolvable:$true] %s46_s10 }
  0x18   :  { %s1528_s11 = scalar_lea.vmem %s47_s10, 1024  ;;  %p1533_p11 = scmp.lt.s32.totalorder %s47_s10, %s47_s10 }
  0x19   :  { %p1529_p10 = scmp.ne.s32.totalorder %s47_s10, %s1528_s11  ;;  %p1534_p12 = scmp.lt.s32.totalorder %s1528_s11, %s1528_s11 }
  0x1b   :  { %p1535_p13 = por %p1534_p12, %p1533_p11 }
  0x1d   :  { %p1536_p0 = pnand %p1535_p13, %p1529_p10 }
  0x1f   :  { %1539 = shalt.err (!%p1536_p0)
}
  0x20   :  { %52 = dma.hbm_to_vmem [thread:$0]  %s1752_s4, 1024, %s47_s10, [#allocation5], %s1546_s26, %s1546_s26, %s1547_s27  }
  0x21   :  { %1540 = dma.done.wait [#allocation3], 1024  }
  0x22   :  { %1541 = vsyncadd [#allocation3], 4294966272 }
  0x23   :  { %1542 = dma.done.wait [#allocation5], 2048  }
  0x24   :  { %1543 = vsyncadd [#allocation5], 4294965248  ;;  %v1440_v0 = vld [vmem:[%s1749_s1 + $0x38] sm:$0xff]   ;;  %v1441_v1 = vld [vmem:[%s1749_s1 + $0x30] sm:$0xff]  }
  0x25   :  { %1304 = vmatprep.subr.bf16.mxu0 %v1440_v0  ;;  %v1442_v2 = vld [vmem:[%s1749_s1 + $0x28] sm:$0xff]   ;;  %v1443_v3 = vld [vmem:[%s1749_s1 + $0x20] sm:$0xff]   ;;  %v1444_v5 = vld [vmem:[%s1749_s1 + $0x18] sm:$0xff]  }
  0x26   :  { %1305 = vmatpush3.bf16.msra.mxu0 %v1440_v0  ;;  %v1448_v4 = vld [vmem:[%s1748_s0] sm:$0xff]   ;;  %v1445_v6 = vld [vmem:[%s1749_s1 + $0x10] sm:$0xff]   ;;  %v1456_v7 = vld [vmem:[#allocation2 + $0x38] sm:$0xff]  }
  0x27   :  { %1306 = vmatprep.subr.bf16.mxu0 %v1441_v1  ;;  %1320 = vmatprep.mubr.bf16.mxu0 %v1448_v4  ;;  %v1457_v8 = vld [vmem:[#allocation2 + $0x30] sm:$0xff]   ;;  %v1446_v9 = vld [vmem:[%s1749_s1 + $0x8] sm:$0xff]   ;;  %v1447_v11 = vld [vmem:[%s1749_s1] sm:$0xff]  }
  0x28   :  { %1336 = vmatprep.subr.bf16.mxu1 %v1456_v7  ;;  %v1458_v10 = vld [vmem:[#allocation2 + $0x28] sm:$0xff]   ;;  %v1459_v12 = vld [vmem:[#allocation2 + $0x20] sm:$0xff]   ;;  %v1460_v13 = vld [vmem:[#allocation2 + $0x18] sm:$0xff]  }
  0x29   :  { %1337 = vmatpush3.bf16.msra.mxu1 %v1456_v7  ;;  %v1449_v14 = vld [vmem:[%s1748_s0 + $0x8] sm:$0xff]   ;;  %v1450_v15 = vld [vmem:[%s1748_s0 + $0x10] sm:$0xff]   ;;  %v1451_v16 = vld [vmem:[%s1748_s0 + $0x18] sm:$0xff]  }
  0x2a   :  { %1307 = vmatpush3.bf16.msra.mxu0 %v1441_v1  ;;  %1338 = vmatprep.subr.bf16.mxu1 %v1457_v8  ;;  %v1452_v17 = vld [vmem:[%s1748_s0 + $0x20] sm:$0xff]   ;;  %v1453_v18 = vld [vmem:[%s1748_s0 + $0x28] sm:$0xff]   ;;  %v1454_v19 = vld [vmem:[%s1748_s0 + $0x30] sm:$0xff]  }
  0x2b   :  { %1308 = vmatprep.subr.bf16.mxu0 %v1442_v2  ;;  %v1455_v20 = vld [vmem:[%s1748_s0 + $0x38] sm:$0xff]   ;;  %v1461_v21 = vld [vmem:[#allocation2 + $0x10] sm:$0xff]   ;;  %v1462_v22 = vld [vmem:[#allocation2 + $0x8] sm:$0xff]  }
  0x2c   :  { %v1463_v23 = vld [vmem:[#allocation2] sm:$0xff]   ;;  %v1464_v24 = vld [vmem:[#allocation4 + $0x38] sm:$0xff]   ;;  %v1465_v25 = vld [vmem:[#allocation4 + $0x30] sm:$0xff]  }
  0x2d   :  { %1339 = vmatpush3.bf16.msra.mxu1 %v1457_v8  ;;  %v1466_v26 = vld [vmem:[#allocation4 + $0x28] sm:$0xff]   ;;  %v1467_v27 = vld [vmem:[#allocation4 + $0x20] sm:$0xff]   ;;  %v1468_v28 = vld [vmem:[#allocation4 + $0x18] sm:$0xff]  }
  0x2e   :  { %1309 = vmatpush3.bf16.msra.mxu0 %v1442_v2  ;;  %1340 = vmatprep.subr.bf16.mxu1 %v1458_v10  ;;  %v1645_v30 = vld [vmem:[%s1753_s5] ss:$0 sm:$0xff] }
  0x2f   :  { %1310 = vmatprep.subr.bf16.mxu0 %v1443_v3 }
  0x31   :  { %1341 = vmatpush3.bf16.msra.mxu1 %v1458_v10 }
  0x32   :  { %1311 = vmatpush3.bf16.msra.mxu0 %v1443_v3  ;;  %1342 = vmatprep.subr.bf16.mxu1 %v1459_v12 }
  0x33   :  { %1312 = vmatprep.subr.bf16.mxu0 %v1444_v5 }
  0x35   :  { %1343 = vmatpush3.bf16.msra.mxu1 %v1459_v12 }
  0x36   :  { %1313 = vmatpush3.bf16.msra.mxu0 %v1444_v5  ;;  %1344 = vmatprep.subr.bf16.mxu1 %v1460_v13 }
  0x37   :  { %1314 = vmatprep.subr.bf16.mxu0 %v1445_v6 }
  0x39   :  { %1345 = vmatpush3.bf16.msra.mxu1 %v1460_v13 }
  0x3a   :  { %1315 = vmatpush3.bf16.msra.mxu0 %v1445_v6  ;;  %1346 = vmatprep.subr.bf16.mxu1 %v1461_v21 }
  0x3b   :  { %1316 = vmatprep.subr.bf16.mxu0 %v1446_v9 }
  0x3d   :  { %1347 = vmatpush3.bf16.msra.mxu1 %v1461_v21 }
  0x3e   :  { %1317 = vmatpush3.bf16.msra.mxu0 %v1446_v9  ;;  %1348 = vmatprep.subr.bf16.mxu1 %v1462_v22 }
  0x3f   :  { %1318 = vmatprep.subr.bf16.mxu0 %v1447_v11 }
  0x41   :  { %1349 = vmatpush3.bf16.msra.mxu1 %v1462_v22 }
  0x42   :  { %1319 = vmatpush3.bf16.msra.mxu0 %v1447_v11  ;;  %1350 = vmatprep.subr.bf16.mxu1 %v1463_v23 }
  0x43   :  { %1368 = vmatprep.subr.bf16.mxu0 %v1464_v24 }
  0x45   :  { %1321 = vmatmul.mubr.bf16.vlgmr.msra.gmra.mxu0 %v1449_v14  ;;  %1351 = vmatpush3.bf16.msra.mxu1 %v1463_v23 }
  0x46   :  { %1324 = vmatprep.mubr.bf16.mxu0 %v1450_v15  ;;  %1369 = vmatpush3.bf16.msra.mxu0 %v1464_v24 }
  0x47   :  { %1370 = vmatprep.subr.bf16.mxu0 %v1465_v25 }
  0x4a   :  { %1371 = vmatpush3.bf16.msra.mxu0 %v1465_v25 }
  0x4b   :  { %1372 = vmatprep.subr.bf16.mxu0 %v1466_v26 }
  0x4d   :  { %1325 = vmatmul.mubr.bf16.gmra.mxu0 %v1451_v16 }
  0x4e   :  { %1328 = vmatprep.mubr.bf16.mxu0 %v1452_v17  ;;  %1373 = vmatpush3.bf16.msra.mxu0 %v1466_v26 }
  0x4f   :  { %1374 = vmatprep.subr.bf16.mxu0 %v1467_v27 }
  0x52   :  { %1375 = vmatpush3.bf16.msra.mxu0 %v1467_v27 }
  0x53   :  { %1376 = vmatprep.subr.bf16.mxu0 %v1468_v28 }
  0x55   :  { %1329 = vmatmul.mubr.bf16.gmra.mxu0 %v1453_v18 }
  0x56   :  { %1332 = vmatprep.mubr.bf16.mxu0 %v1454_v19  ;;  %1377 = vmatpush3.bf16.msra.mxu0 %v1468_v28 }
  0x5d   :  { %1333 = vmatmul.mubr.bf16.gmra.mxu0 %v1455_v20 }
 0x105   :  { %v1322_v29 = vpop.f32.mrf.mxu0 }
 0x106   :  { %v241_v33 = vadd.f32 %v1322_v29, %v1645_v30 }
 0x107   :  { %v232_v31 = vpop.f32.mrf.mxu0 }
 0x108   :  { %v233_v32 = vadd.f32 %v1645_v30, %v232_v31  ;;  %v313_v40 = vmul.f32 0.01, %v241_v33  ;;  %vm297_vm2 = vcmp.ge.f32.partialorder %v241_v33, 0.0 }
 0x109   :  { %v1323_v34 = vpop.f32.mrf.mxu0 }
 0x10a   :  { %v244_v35 = vadd.f32 %v1323_v34, %v1645_v30  ;;  %v311_v37 = vmul.f32 0.01, %v233_v32  ;;  %vm295_vm1 = vcmp.ge.f32.partialorder %v233_v32, 0.0  ;;  %v329_v51 = vsel %vm297_vm2, %v241_v33, %v313_v40  ;;  %v1470_v40 = vld [vmem:[#allocation4 + $0x8] sm:$0xff]  }
 0x10b   :  { %v235_v36 = vpop.f32.mrf.mxu0 }
 0x10c   :  { %vm298_vm0 = vcmp.ge.f32.partialorder %v244_v35, 0.0  ;;  %v314_v38 = vmul.f32 0.01, %v244_v35  ;;  %v236_v39 = vadd.f32 %v1645_v30, %v235_v36  ;;  %v327_v47 = vsel %vm295_vm1, %v233_v32, %v311_v37 }
 0x10d   :  { %v1326_v41 = vpop.f32.mrf.mxu0 }
 0x10e   :  { %v312_v42 = vmul.f32 0.01, %v236_v39  ;;  %vm296_vm3 = vcmp.ge.f32.partialorder %v236_v39, 0.0  ;;  %v257_v43 = vadd.f32 %v1326_v41, %v1645_v30  ;;  %v330_v45 = vsel %vm298_vm0, %v244_v35, %v314_v38  ;;  %v1471_v41 = vld [vmem:[#allocation4] sm:$0xff]  }
 0x10f   :  { %v248_v44 = vpop.f32.mrf.mxu0  ;;  %v344_v53 = vpack.c.bf16 %v330_v45, %v329_v51  ;;  %v1476_v45 = vld [vmem:[#allocation6 + $0x18] sm:$0xff]  }
 0x110   :  { %v249_v46 = vadd.f32 %v1645_v30, %v248_v44  ;;  %v328_v48 = vsel %vm296_vm3, %v236_v39, %v312_v42  ;;  %v317_v54 = vmul.f32 0.01, %v257_v43  ;;  %vm301_vm5 = vcmp.ge.f32.partialorder %v257_v43, 0.0  ;;  %v1469_v39 = vld [vmem:[#allocation4 + $0x10] sm:$0xff]   ;;  %v1475_v44 = vld [vmem:[#allocation6 + $0x20] sm:$0xff]  }
 0x111   :  { %v1327_v49 = vpop.f32.mrf.mxu0  ;;  %v343_v50 = vpack.c.bf16 %v328_v48, %v327_v47  ;;  %1378 = vmatprep.subr.bf16.mxu0 %v1469_v39  ;;  %v1473_v42 = vld [vmem:[#allocation6 + $0x30] sm:$0xff]   ;;  %v1666_v47 = vld [vmem:[%s1753_s5 + $0x1] ss:$0 sm:$0xff] }
 0x112   :  { %v260_v52 = vadd.f32 %v1327_v49, %v1645_v30  ;;  %v315_v56 = vmul.f32 0.01, %v249_v46  ;;  %vm299_vm6 = vcmp.ge.f32.partialorder %v249_v46, 0.0  ;;  %v333_v2 = vsel %vm301_vm5, %v257_v43, %v317_v54  ;;  %1379 = vmatpush3.bf16.msra.mxu0 %v1469_v39  ;;  %v1474_v43 = vld [vmem:[#allocation6 + $0x28] sm:$0xff]  }
 0x113   :  { %v251_v55 = vpop.f32.mrf.mxu0  ;;  %1352 = vmatprep.mubr.bf16.mxu1 %v343_v50  ;;  %1380 = vmatprep.subr.bf16.mxu0 %v1470_v40 }
 0x114   :  { %vm302_vm4 = vcmp.ge.f32.partialorder %v260_v52, 0.0  ;;  %v318_v57 = vmul.f32 0.01, %v260_v52  ;;  %v252_v58 = vadd.f32 %v1645_v30, %v251_v55  ;;  %1353 = vmatmul.mubr.bf16.vlgmr.msra.gmra.mxu1 %v344_v53  ;;  %v331_v0 = vsel %vm299_vm6, %v249_v46, %v315_v56 }
 0x115   :  { %v1330_v59 = vpop.f32.mrf.mxu0 }
 0x116   :  { %vm300_vm7 = vcmp.ge.f32.partialorder %v252_v58, 0.0  ;;  %v316_v60 = vmul.f32 0.01, %v252_v58  ;;  %v273_v61 = vadd.f32 %v1330_v59, %v1645_v30  ;;  %v334_v62 = vsel %vm302_vm4, %v260_v52, %v318_v57  ;;  %1381 = vmatpush3.bf16.msra.mxu0 %v1470_v40 }
 0x117   :  { %v264_v63 = vpop.f32.mrf.mxu0  ;;  %v346_v6 = vpack.c.bf16 %v334_v62, %v333_v2  ;;  %1382 = vmatprep.subr.bf16.mxu0 %v1471_v41 }
 0x118   :  { %v332_v1 = vsel %vm300_vm7, %v252_v58, %v316_v60  ;;  %v265_v3 = vadd.f32 %v1645_v30, %v264_v63  ;;  %v321_v4 = vmul.f32 0.01, %v273_v61  ;;  %vm305_vm8 = vcmp.ge.f32.partialorder %v273_v61, 0.0 }
 0x119   :  { %v345_v5 = vpack.c.bf16 %v332_v1, %v331_v0  ;;  %v1331_v7 = vpop.f32.mrf.mxu0 }
 0x11a   :  { %vm303_vm9 = vcmp.ge.f32.partialorder %v265_v3, 0.0  ;;  %v319_v8 = vmul.f32 0.01, %v265_v3  ;;  %v276_v9 = vadd.f32 %v1331_v7, %v1645_v30  ;;  %v337_v15 = vsel %vm305_vm8, %v273_v61, %v321_v4  ;;  %1383 = vmatpush3.bf16.msra.mxu0 %v1471_v41 }
 0x11b   :  { %1356 = vmatprep.mubr.bf16.mxu1 %v345_v5  ;;  %v267_v10 = vpop.f32.mrf.mxu0 }
 0x11c   :  { %1357 = vmatmul.mubr.bf16.gmra.mxu1 %v346_v6  ;;  %vm306_vm10 = vcmp.ge.f32.partialorder %v276_v9, 0.0  ;;  %v322_v11 = vmul.f32 0.01, %v276_v9  ;;  %v268_v12 = vadd.f32 %v1645_v30, %v267_v10  ;;  %v335_v14 = vsel %vm303_vm9, %v265_v3, %v319_v8 }
 0x11d   :  { %v1334_v13 = vpop.f32.mrf.mxu0 }
 0x11e   :  { %vm304_vm11 = vcmp.ge.f32.partialorder %v268_v12, 0.0  ;;  %v320_v16 = vmul.f32 0.01, %v268_v12  ;;  %v289_v17 = vadd.f32 %v1334_v13, %v1645_v30  ;;  %v338_v18 = vsel %vm306_vm10, %v276_v9, %v322_v11 }
 0x11f   :  { %v280_v19 = vpop.f32.mrf.mxu0  ;;  %v348_v22 = vpack.c.bf16 %v338_v18, %v337_v15 }
 0x120   :  { %v281_v20 = vadd.f32 %v1645_v30, %v280_v19  ;;  %v336_v21 = vsel %vm304_vm11, %v268_v12, %v320_v16  ;;  %v325_v23 = vmul.f32 0.01, %v289_v17  ;;  %vm309_vm12 = vcmp.ge.f32.partialorder %v289_v17, 0.0 }
 0x121   :  { %v347_v24 = vpack.c.bf16 %v336_v21, %v335_v14  ;;  %v1335_v25 = vpop.f32.mrf.mxu0 }
 0x122   :  { %v323_v26 = vmul.f32 0.01, %v281_v20  ;;  %v292_v27 = vadd.f32 %v1335_v25, %v1645_v30  ;;  %vm307_vm13 = vcmp.ge.f32.partialorder %v281_v20, 0.0  ;;  %v341_v32 = vsel %vm309_vm12, %v289_v17, %v325_v23 }
 0x123   :  { %1360 = vmatprep.mubr.bf16.mxu1 %v347_v24  ;;  %v283_v28 = vpop.f32.mrf.mxu0 }
 0x124   :  { %1361 = vmatmul.mubr.bf16.gmra.mxu1 %v348_v22  ;;  %vm310_vm14 = vcmp.ge.f32.partialorder %v292_v27, 0.0  ;;  %v326_v29 = vmul.f32 0.01, %v292_v27  ;;  %v284_v31 = vadd.f32 %v1645_v30, %v283_v28  ;;  %v339_v34 = vsel %vm307_vm13, %v281_v20, %v323_v26  ;;  %v1472_v30 = vld [vmem:[#allocation6 + $0x38] sm:$0xff]  }
 0x125   :  { %1400 = vmatprep.subr.bf16.mxu1 %v1472_v30 }
 0x126   :  { %vm308_vm15 = vcmp.ge.f32.partialorder %v284_v31, 0.0  ;;  %v324_v33 = vmul.f32 0.01, %v284_v31  ;;  %v342_v35 = vsel %vm310_vm14, %v292_v27, %v326_v29  ;;  %1401 = vmatpush3.bf16.msra.mxu1 %v1472_v30 }
 0x127   :  { %v350_v37 = vpack.c.bf16 %v342_v35, %v341_v32  ;;  %1402 = vmatprep.subr.bf16.mxu1 %v1473_v42 }
 0x128   :  { %v340_v36 = vsel %vm308_vm15, %v284_v31, %v324_v33 }
 0x129   :  { %v349_v38 = vpack.c.bf16 %v340_v36, %v339_v34 }
 0x12a   :  { %1403 = vmatpush3.bf16.msra.mxu1 %v1473_v42 }
 0x12b   :  { %1364 = vmatprep.mubr.bf16.mxu1 %v349_v38  ;;  %1404 = vmatprep.subr.bf16.mxu1 %v1474_v43 }
 0x12c   :  { %1365 = vmatmul.mubr.bf16.gmra.mxu1 %v350_v37 }
 0x12e   :  { %1405 = vmatpush3.bf16.msra.mxu1 %v1474_v43 }
 0x12f   :  { %1406 = vmatprep.subr.bf16.mxu1 %v1475_v44 }
 0x132   :  { %1407 = vmatpush3.bf16.msra.mxu1 %v1475_v44 }
 0x133   :  { %1408 = vmatprep.subr.bf16.mxu1 %v1476_v45 }
 0x136   :  { %1409 = vmatpush3.bf16.msra.mxu1 %v1476_v45 }
 0x1d4   :  { %v1354_v46 = vpop.f32.mrf.mxu1 }
 0x1d5   :  { %v463_v50 = vadd.f32 %v1354_v46, %v1666_v47 }
 0x1d6   :  { %v454_v48 = vpop.f32.mrf.mxu1 }
 0x1d7   :  { %v455_v49 = vadd.f32 %v1666_v47, %v454_v48  ;;  %v535_v57 = vmul.f32 0.01, %v463_v50  ;;  %vm519_vm2 = vcmp.ge.f32.partialorder %v463_v50, 0.0 }
 0x1d8   :  { %v1355_v51 = vpop.f32.mrf.mxu1 }
 0x1d9   :  { %v466_v52 = vadd.f32 %v1355_v51, %v1666_v47  ;;  %v533_v54 = vmul.f32 0.01, %v455_v49  ;;  %vm517_vm1 = vcmp.ge.f32.partialorder %v455_v49, 0.0  ;;  %v551_v2 = vsel %vm519_vm2, %v463_v50, %v535_v57  ;;  %v1478_v57 = vld [vmem:[#allocation6 + $0x8] sm:$0xff]  }
 0x1da   :  { %v457_v53 = vpop.f32.mrf.mxu1 }
 0x1db   :  { %vm520_vm0 = vcmp.ge.f32.partialorder %v466_v52, 0.0  ;;  %v536_v55 = vmul.f32 0.01, %v466_v52  ;;  %v458_v56 = vadd.f32 %v1666_v47, %v457_v53  ;;  %v549_v0 = vsel %vm517_vm1, %v455_v49, %v533_v54 }
 0x1dc   :  { %v1358_v58 = vpop.f32.mrf.mxu1 }
 0x1dd   :  { %vm518_vm3 = vcmp.ge.f32.partialorder %v458_v56, 0.0  ;;  %v534_v59 = vmul.f32 0.01, %v458_v56  ;;  %v552_v60 = vsel %vm520_vm0, %v466_v52, %v536_v55  ;;  %v479_v61 = vadd.f32 %v1358_v58, %v1666_v47  ;;  %v1479_v58 = vld [vmem:[#allocation6] sm:$0xff]  }
 0x1de   :  { %v470_v62 = vpop.f32.mrf.mxu1  ;;  %v566_v5 = vpack.c.bf16 %v552_v60, %v551_v2 }
 0x1df   :  { %v471_v63 = vadd.f32 %v1666_v47, %v470_v62  ;;  %v550_v1 = vsel %vm518_vm3, %v458_v56, %v534_v59  ;;  %v539_v7 = vmul.f32 0.01, %v479_v61  ;;  %vm523_vm5 = vcmp.ge.f32.partialorder %v479_v61, 0.0  ;;  %v1477_v56 = vld [vmem:[#allocation6 + $0x10] sm:$0xff]   ;;  %v1687_v59 = vld [vmem:[%s1753_s5 + $0x2] ss:$0 sm:$0xff] }
 0x1e0   :  { %v1359_v3 = vpop.f32.mrf.mxu1  ;;  %v565_v4 = vpack.c.bf16 %v550_v1, %v549_v0  ;;  %1410 = vmatprep.subr.bf16.mxu1 %v1477_v56 }
 0x1e1   :  { %v482_v6 = vadd.f32 %v1359_v3, %v1666_v47  ;;  %v537_v9 = vmul.f32 0.01, %v471_v63  ;;  %vm521_vm6 = vcmp.ge.f32.partialorder %v471_v63, 0.0  ;;  %v555_v19 = vsel %vm523_vm5, %v479_v61, %v539_v7  ;;  %1411 = vmatpush3.bf16.msra.mxu1 %v1477_v56 }
 0x1e2   :  { %v473_v8 = vpop.f32.mrf.mxu1  ;;  %1384 = vmatprep.mubr.bf16.mxu0 %v565_v4  ;;  %1412 = vmatprep.subr.bf16.mxu1 %v1478_v57 }
 0x1e3   :  { %vm524_vm4 = vcmp.ge.f32.partialorder %v482_v6, 0.0  ;;  %v540_v10 = vmul.f32 0.01, %v482_v6  ;;  %v474_v11 = vadd.f32 %v1666_v47, %v473_v8  ;;  %1385 = vmatmul.mubr.bf16.vlgmr.msra.gmra.mxu0 %v566_v5  ;;  %v553_v17 = vsel %vm521_vm6, %v471_v63, %v537_v9 }
 0x1e4   :  { %v1362_v12 = vpop.f32.mrf.mxu1 }
 0x1e5   :  { %vm522_vm7 = vcmp.ge.f32.partialorder %v474_v11, 0.0  ;;  %v538_v13 = vmul.f32 0.01, %v474_v11  ;;  %v495_v14 = vadd.f32 %v1362_v12, %v1666_v47  ;;  %v556_v15 = vsel %vm524_vm4, %v482_v6, %v540_v10  ;;  %1413 = vmatpush3.bf16.msra.mxu1 %v1478_v57 }
 0x1e6   :  { %v486_v16 = vpop.f32.mrf.mxu1  ;;  %v568_v23 = vpack.c.bf16 %v556_v15, %v555_v19  ;;  %1414 = vmatprep.subr.bf16.mxu1 %v1479_v58 }
 0x1e7   :  { %v554_v18 = vsel %vm522_vm7, %v474_v11, %v538_v13  ;;  %v487_v20 = vadd.f32 %v1666_v47, %v486_v16  ;;  %v543_v21 = vmul.f32 0.01, %v495_v14  ;;  %vm527_vm8 = vcmp.ge.f32.partialorder %v495_v14, 0.0 }
 0x1e8   :  { %v567_v22 = vpack.c.bf16 %v554_v18, %v553_v17  ;;  %v1363_v24 = vpop.f32.mrf.mxu1 }
 0x1e9   :  { %vm525_vm9 = vcmp.ge.f32.partialorder %v487_v20, 0.0  ;;  %v541_v25 = vmul.f32 0.01, %v487_v20  ;;  %v498_v26 = vadd.f32 %v1363_v24, %v1666_v47  ;;  %v559_v33 = vsel %vm527_vm8, %v495_v14, %v543_v21  ;;  %1415 = vmatpush3.bf16.msra.mxu1 %v1479_v58 }
 0x1ea   :  { %1388 = vmatprep.mubr.bf16.mxu0 %v567_v22  ;;  %v489_v27 = vpop.f32.mrf.mxu1 }
 0x1eb   :  { %1389 = vmatmul.mubr.bf16.gmra.mxu0 %v568_v23  ;;  %vm528_vm10 = vcmp.ge.f32.partialorder %v498_v26, 0.0  ;;  %v544_v28 = vmul.f32 0.01, %v498_v26  ;;  %v490_v29 = vadd.f32 %v1666_v47, %v489_v27  ;;  %v557_v32 = vsel %vm525_vm9, %v487_v20, %v541_v25 }
 0x1ec   :  { %v1366_v31 = vpop.f32.mrf.mxu1 }
 0x1ed   :  { %vm526_vm11 = vcmp.ge.f32.partialorder %v490_v29, 0.0  ;;  %v542_v34 = vmul.f32 0.01, %v490_v29  ;;  %v511_v35 = vadd.f32 %v1366_v31, %v1666_v47  ;;  %v560_v36 = vsel %vm528_vm10, %v498_v26, %v544_v28 }
 0x1ee   :  { %v502_v37 = vpop.f32.mrf.mxu1  ;;  %v570_v40 = vpack.c.bf16 %v560_v36, %v559_v33 }
 0x1ef   :  { %v503_v38 = vadd.f32 %v1666_v47, %v502_v37  ;;  %v558_v39 = vsel %vm526_vm11, %v490_v29, %v542_v34  ;;  %v547_v41 = vmul.f32 0.01, %v511_v35  ;;  %vm531_vm12 = vcmp.ge.f32.partialorder %v511_v35, 0.0 }
 0x1f0   :  { %v569_v30 = vpack.c.bf16 %v558_v39, %v557_v32  ;;  %v1367_v42 = vpop.f32.mrf.mxu1 }
 0x1f1   :  { %v545_v43 = vmul.f32 0.01, %v503_v38  ;;  %v514_v44 = vadd.f32 %v1367_v42, %v1666_v47  ;;  %vm529_vm13 = vcmp.ge.f32.partialorder %v503_v38, 0.0  ;;  %v563_v49 = vsel %vm531_vm12, %v511_v35, %v547_v41 }
 0x1f2   :  { %1392 = vmatprep.mubr.bf16.mxu0 %v569_v30  ;;  %v505_v45 = vpop.f32.mrf.mxu1 }
 0x1f3   :  { %1393 = vmatmul.mubr.bf16.gmra.mxu0 %v570_v40  ;;  %vm532_vm14 = vcmp.ge.f32.partialorder %v514_v44, 0.0  ;;  %v548_v46 = vmul.f32 0.01, %v514_v44  ;;  %v506_v48 = vadd.f32 %v1666_v47, %v505_v45  ;;  %v561_v51 = vsel %vm529_vm13, %v503_v38, %v545_v43 }
 0x1f5   :  { %vm530_vm15 = vcmp.ge.f32.partialorder %v506_v48, 0.0  ;;  %v546_v50 = vmul.f32 0.01, %v506_v48  ;;  %v564_v52 = vsel %vm532_vm14, %v514_v44, %v548_v46 }
 0x1f6   :  { %v572_v54 = vpack.c.bf16 %v564_v52, %v563_v49 }
 0x1f7   :  { %v562_v53 = vsel %vm530_vm15, %v506_v48, %v546_v50 }
 0x1f8   :  { %v571_v55 = vpack.c.bf16 %v562_v53, %v561_v51 }
 0x1fa   :  { %1396 = vmatprep.mubr.bf16.mxu0 %v571_v55 }
 0x1fb   :  { %1397 = vmatmul.mubr.bf16.gmra.mxu0 %v572_v54 }
 0x2a3   :  { %v1386_v47 = vpop.f32.mrf.mxu0 }
 0x2a4   :  { %v685_v62 = vadd.f32 %v1386_v47, %v1687_v59 }
 0x2a5   :  { %v676_v60 = vpop.f32.mrf.mxu0 }
 0x2a6   :  { %v677_v61 = vadd.f32 %v1687_v59, %v676_v60  ;;  %v757_v5 = vmul.f32 0.01, %v685_v62  ;;  %vm741_vm2 = vcmp.ge.f32.partialorder %v685_v62, 0.0 }
 0x2a7   :  { %v1387_v63 = vpop.f32.mrf.mxu0 }
 0x2a8   :  { %v688_v0 = vadd.f32 %v1387_v63, %v1687_v59  ;;  %v755_v2 = vmul.f32 0.01, %v677_v61  ;;  %vm739_vm1 = vcmp.ge.f32.partialorder %v677_v61, 0.0  ;;  %v773_v14 = vsel %vm741_vm2, %v685_v62, %v757_v5 }
 0x2a9   :  { %v679_v1 = vpop.f32.mrf.mxu0  ;;  %vm1103_vm2 = vcmask 261312  }
 0x2aa   :  { %vm742_vm0 = vcmp.ge.f32.partialorder %v688_v0, 0.0  ;;  %v758_v3 = vmul.f32 0.01, %v688_v0  ;;  %v680_v4 = vadd.f32 %v1687_v59, %v679_v1  ;;  %v771_v12 = vsel %vm739_vm1, %v677_v61, %v755_v2 }
 0x2ab   :  { %v1390_v6 = vpop.f32.mrf.mxu0  ;;  %vm1096_vm1 = vcmask 195712  }
 0x2ac   :  { %vm740_vm3 = vcmp.ge.f32.partialorder %v680_v4, 0.0  ;;  %v756_v7 = vmul.f32 0.01, %v680_v4  ;;  %v774_v8 = vsel %vm742_vm0, %v688_v0, %v758_v3  ;;  %v701_v9 = vadd.f32 %v1390_v6, %v1687_v59 }
 0x2ad   :  { %v692_v10 = vpop.f32.mrf.mxu0  ;;  %v788_v17 = vpack.c.bf16 %v774_v8, %v773_v14  ;;  %vm1089_vm0 = vcmask 130112  }
 0x2ae   :  { %v693_v11 = vadd.f32 %v1687_v59, %v692_v10  ;;  %v772_v13 = vsel %vm740_vm3, %v680_v4, %v756_v7  ;;  %v761_v19 = vmul.f32 0.01, %v701_v9  ;;  %vm745_vm5 = vcmp.ge.f32.partialorder %v701_v9, 0.0 }
 0x2af   :  { %v1391_v15 = vpop.f32.mrf.mxu0  ;;  %v787_v16 = vpack.c.bf16 %v772_v13, %v771_v12  ;;  %v1549_v4 = vmov 0   ;;  %vm1110_vm3 = vcmask 326912  }
 0x2b0   :  { %v704_v18 = vadd.f32 %v1391_v15, %v1687_v59  ;;  %v759_v21 = vmul.f32 0.01, %v693_v11  ;;  %vm743_vm6 = vcmp.ge.f32.partialorder %v693_v11, 0.0  ;;  %v777_v32 = vsel %vm745_vm5, %v701_v9, %v761_v19  ;;  %1438 = vset.pattern.permute.xlu1 %v1549_v4  ;;  %1439 = vset.pattern.permute.xlu0 %v1549_v4 }
 0x2b1   :  { %v695_v20 = vpop.f32.mrf.mxu0  ;;  %1416 = vmatprep.mubr.bf16.mxu1 %v787_v16  ;;  %v988_v16 = vld [vmem:[%s1753_s5 + $0x3] sm:$0x1]  ;;  %vm1124_vm5 = vcmask 458112  }
 0x2b2   :  { %vm746_vm4 = vcmp.ge.f32.partialorder %v704_v18, 0.0  ;;  %v762_v22 = vmul.f32 0.01, %v704_v18  ;;  %v696_v23 = vadd.f32 %v1687_v59, %v695_v20  ;;  %1417 = vmatmul.mubr.bf16.vlgmr.msra.gmra.mxu1 %v788_v17  ;;  %v775_v29 = vsel %vm743_vm6, %v693_v11, %v759_v21 }
 0x2b3   :  { %v1394_v24 = vpop.f32.mrf.mxu0  ;;  %vm1131_vm6 = vcmask 523712  }
 0x2b4   :  { %vm744_vm7 = vcmp.ge.f32.partialorder %v696_v23, 0.0  ;;  %v760_v25 = vmul.f32 0.01, %v696_v23  ;;  %v717_v26 = vadd.f32 %v1394_v24, %v1687_v59  ;;  %v778_v27 = vsel %vm746_vm4, %v704_v18, %v762_v22 }
 0x2b5   :  { %v708_v28 = vpop.f32.mrf.mxu0  ;;  %v790_v36 = vpack.c.bf16 %v778_v27, %v777_v32  ;;  %v993_v24 = vlaneseq  ;;  %vm1117_vm4 = vcmask 392512  }
 0x2b6   :  { %v776_v31 = vsel %vm744_vm7, %v696_v23, %v760_v25  ;;  %v709_v33 = vadd.f32 %v1687_v59, %v708_v28  ;;  %v765_v34 = vmul.f32 0.01, %v717_v26  ;;  %vm749_vm8 = vcmp.ge.f32.partialorder %v717_v26, 0.0 }
 0x2b7   :  { %v789_v35 = vpack.c.bf16 %v776_v31, %v775_v29  ;;  %v1395_v37 = vpop.f32.mrf.mxu0  ;;  %v1708_v27 = vshrl.u32 %v993_v24, 7  ;;  %vm1138_vm7 = vcmask 589312  }
 0x2b8   :  { %vm747_vm9 = vcmp.ge.f32.partialorder %v709_v33, 0.0  ;;  %v763_v38 = vmul.f32 0.01, %v709_v33  ;;  %v720_v39 = vadd.f32 %v1395_v37, %v1687_v59  ;;  %v781_v44 = vsel %vm749_vm8, %v717_v26, %v765_v34 }
 0x2b9   :  { %1420 = vmatprep.mubr.bf16.mxu1 %v789_v35  ;;  %v711_v40 = vpop.f32.mrf.mxu0  ;;  %v995_v31 = vsub.s32 0, %v1708_v27  ;;  %vm1145_vm8 = vcmask 654912  }
 0x2ba   :  { %1421 = vmatmul.mubr.bf16.gmra.mxu1 %v790_v36  ;;  %vm750_vm10 = vcmp.ge.f32.partialorder %v720_v39, 0.0  ;;  %v766_v41 = vmul.f32 0.01, %v720_v39  ;;  %v712_v30 = vadd.f32 %v1687_v59, %v711_v40  ;;  %v779_v43 = vsel %vm747_vm9, %v709_v33, %v763_v38 }
 0x2bb   :  { %v1398_v42 = vpop.f32.mrf.mxu0  ;;  %vm1152_vm9 = vcmask 720512  }
 0x2bc   :  { %vm748_vm11 = vcmp.ge.f32.partialorder %v712_v30, 0.0  ;;  %v764_v45 = vmul.f32 0.01, %v712_v30  ;;  %v733_v46 = vadd.f32 %v1398_v42, %v1687_v59  ;;  %v782_v48 = vsel %vm750_vm10, %v720_v39, %v766_v41 }
 0x2bd   :  { %v724_v49 = vpop.f32.mrf.mxu0  ;;  %v792_v52 = vpack.c.bf16 %v782_v48, %v781_v44  ;;  %vm1159_vm10 = vcmask 786112  }
 0x2be   :  { %v725_v50 = vadd.f32 %v1687_v59, %v724_v49  ;;  %v780_v51 = vsel %vm748_vm11, %v712_v30, %v764_v45  ;;  %v769_v53 = vmul.f32 0.01, %v733_v46  ;;  %vm753_vm12 = vcmp.ge.f32.partialorder %v733_v46, 0.0 }
 0x2bf   :  { %v791_v54 = vpack.c.bf16 %v780_v51, %v779_v43  ;;  %v1399_v55 = vpop.f32.mrf.mxu0  ;;  %vm1166_vm11 = vcmask 851712  }
 0x2c0   :  { %v767_v56 = vmul.f32 0.01, %v725_v50  ;;  %v736_v57 = vadd.f32 %v1399_v55, %v1687_v59  ;;  %vm751_vm13 = vcmp.ge.f32.partialorder %v725_v50, 0.0  ;;  %v785_v61 = vsel %vm753_vm12, %v733_v46, %v769_v53 }
 0x2c1   :  { %1424 = vmatprep.mubr.bf16.mxu1 %v791_v54  ;;  %v727_v58 = vpop.f32.mrf.mxu0  ;;  %vm1173_vm12 = vcmask 917312  }
 0x2c2   :  { %1425 = vmatmul.mubr.bf16.gmra.mxu1 %v792_v52  ;;  %vm754_vm14 = vcmp.ge.f32.partialorder %v736_v57, 0.0  ;;  %v770_v47 = vmul.f32 0.01, %v736_v57  ;;  %v728_v60 = vadd.f32 %v1687_v59, %v727_v58  ;;  %v783_v63 = vsel %vm751_vm13, %v725_v50, %v767_v56 }
 0x2c3   :  { %vm1180_vm13 = vcmask 982912  }
 0x2c4   :  { %vm752_vm15 = vcmp.ge.f32.partialorder %v728_v60, 0.0  ;;  %v768_v62 = vmul.f32 0.01, %v728_v60  ;;  %v786_v0 = vsel %vm754_vm14, %v736_v57, %v770_v47  ;;  %vm1187_vm14 = vcmask 1048512  }
 0x2c5   :  { %v794_v2 = vpack.c.bf16 %v786_v0, %v785_v61 }
 0x2c6   :  { %v784_v1 = vsel %vm752_vm15, %v728_v60, %v768_v62  ;;  %v1711_v62 = vand.u32 127, %v993_v24 }
 0x2c7   :  { %v793_v3 = vpack.c.bf16 %v784_v1, %v783_v63 }
 0x2c8   :  { %v1084_v63 = vadd.s32 4294967288, %v1711_v62  ;;  %v1082_v4 = vsub.s32 %v1711_v62, %v1708_v27  ;;  %v1126_v24 = vadd.s32 4294967240, %v1711_v62 }
 0x2c9   :  { %1428 = vmatprep.mubr.bf16.mxu1 %v793_v3 }
 0x2ca   :  { %1429 = vmatmul.mubr.bf16.gmra.mxu1 %v794_v2  ;;  %v1087_v1 = vsub.s32 %v1084_v63, %v1708_v27  ;;  %v1091_v2 = vadd.s32 4294967280, %v1711_v62 }
 0x372   :  { %v1418_v5 = vpop.f32.mrf.mxu1 }
 0x373   :  { %960 = vadd.xlane.f32.xlu1 %v1418_v5  ;;  %v1105_v5 = vadd.s32 4294967264, %v1711_v62 }
 0x374   :  { %v893_v6 = vpop.f32.mrf.mxu1 }
 0x375   :  { %956 = vadd.xlane.f32.xlu0 %v893_v6  ;;  %v1098_v6 = vadd.s32 4294967272, %v1711_v62 }
 0x376   :  { %v1419_v7 = vpop.f32.mrf.mxu1 }
 0x377   :  { %962 = vadd.xlane.f32.xlu1 %v1419_v7 }
 0x378   :  { %v896_v59 = vpop.f32.mrf.mxu1 }
 0x379   :  { %958 = vadd.xlane.f32.xlu0 %v896_v59 }
 0x37a   :  { %v1422_v8 = vpop.f32.mrf.mxu1 }
 0x37c   :  { %v909_v9 = vpop.f32.mrf.mxu1 }
 0x37d   :  { %968 = vadd.xlane.f32.xlu0 %v1422_v8  ;;  %v1094_v8 = vsub.s32 %v1091_v2, %v1708_v27 }
 0x37e   :  { %v1423_v10 = vpop.f32.mrf.mxu1 }
 0x380   :  { %v912_v11 = vpop.f32.mrf.mxu1 }
 0x381   :  { %964 = vadd.xlane.f32.xlu0 %v909_v9  ;;  %966 = vadd.xlane.f32.xlu1 %v912_v11  ;;  %v1108_v11 = vsub.s32 %v1105_v5, %v1708_v27 }
 0x382   :  { %v1426_v12 = vpop.f32.mrf.mxu1 }
 0x384   :  { %v925_v13 = vpop.f32.mrf.mxu1 }
 0x385   :  { %970 = vadd.xlane.f32.xlu0 %v1423_v10 }
 0x386   :  { %v1427_v14 = vpop.f32.mrf.mxu1 }
 0x388   :  { %v928_v15 = vpop.f32.mrf.mxu1 }
 0x389   :  { %976 = vadd.xlane.f32.xlu0 %v1426_v12  ;;  %v1101_v12 = vsub.s32 %v1098_v6, %v1708_v27 }
 0x38a   :  { %v1430_v17 = vpop.f32.mrf.mxu1 }
 0x38c   :  { %v941_v18 = vpop.f32.mrf.mxu1 }
 0x38d   :  { %972 = vadd.xlane.f32.xlu0 %v925_v13 }
 0x38e   :  { %v1431_v19 = vpop.f32.mrf.mxu1 }
 0x390   :  { %v944_v20 = vpop.f32.mrf.mxu1 }
 0x391   :  { %974 = vadd.xlane.f32.xlu0 %v928_v15 }
 0x392   :  { %991 = vperm.xlu1 %1438, %v988_v16  }
 0x395   :  { %984 = vadd.xlane.f32.xlu0 %v1430_v17 }
 0x399   :  { %980 = vadd.xlane.f32.xlu0 %v941_v18  ;;  %v1119_v18 = vadd.s32 4294967248, %v1711_v62 }
 0x39d   :  { %982 = vadd.xlane.f32.xlu0 %v944_v20 }
 0x3a1   :  { %986 = vadd.xlane.f32.xlu0 %v1431_v19 }
 0x3b6   :  { %978 = vadd.xlane.f32.xlu1 %v1427_v14  ;;  %v1112_v14 = vadd.s32 4294967256, %v1711_v62 }
 0x3fc   :  { %v961_v22 = vpop.xlane.xlu1 %960 }
 0x3fe   :  { %v957_v21 = vpop.xlane.xlu0 %956 }
 0x400   :  { %v963_v25 = vpop.xlane.xlu1 %962 }
 0x402   :  { %v959_v23 = vpop.xlane.xlu0 %958 }
 0x406   :  { %v969_v26 = vpop.xlane.xlu0 %968 }
 0x40a   :  { %v965_v28 = vpop.xlane.xlu0 %964  ;;  %v967_v29 = vpop.xlane.xlu1 %966 }
 0x40e   :  { %v971_v32 = vpop.xlane.xlu0 %970  ;;  %v992_v33 = vpop.permute.xlu1 %991 }
 0x40f   :  { %v996_v34 = vrot.slane %v992_v33, %v995_v31  ;;  %v1147_v33 = vadd.s32 4294967216, %v1711_v62 }
 0x411   :  { %v1000_v35 = vadd.f32 %v996_v34, %v961_v22  ;;  %v998_v36 = vadd.f32 %v996_v34, %v957_v21  ;;  %v1001_v38 = vadd.f32 %v996_v34, %v963_v25  ;;  %v1005_v39 = vadd.f32 %v996_v34, %v971_v32 }
 0x412   :  { %v977_v37 = vpop.xlane.xlu0 %976  ;;  %v999_v41 = vadd.f32 %v996_v34, %v959_v23  ;;  %v1003_v30 = vadd.f32 %v996_v34, %v967_v29  ;;  %v1004_v42 = vadd.f32 %v996_v34, %v969_v26  ;;  %v1002_v44 = vadd.f32 %v996_v34, %v965_v28 }
 0x413   :  { %1037 = vperm.xlu1 %1438, %v1000_v35   ;;  %1031 = vperm.xlu0 %1439, %v998_v36   ;;  %v1008_v46 = vadd.f32 %v996_v34, %v977_v37  ;;  %v1115_v21 = vsub.s32 %v1112_v14, %v1708_v27  ;;  %v1133_v23 = vadd.s32 4294967232, %v1711_v62  ;;  %v1122_v26 = vsub.s32 %v1119_v18, %v1708_v27 }
 0x414   :  { %v1140_v32 = vadd.s32 4294967224, %v1711_v62  ;;  %v1129_v35 = vsub.s32 %v1126_v24, %v1708_v27  ;;  %v1154_v37 = vadd.s32 4294967208, %v1711_v62 }
 0x416   :  { %v973_v40 = vpop.xlane.xlu0 %972 }
 0x417   :  { %1040 = vperm.xlu1 %1438, %v1001_v38   ;;  %1052 = vperm.xlu0 %1439, %v1005_v39   ;;  %v1006_v48 = vadd.f32 %v996_v34, %v973_v40  ;;  %v1161_v39 = vadd.s32 4294967200, %v1711_v62 }
 0x41a   :  { %v975_v43 = vpop.xlane.xlu0 %974 }
 0x41b   :  { %1034 = vperm.xlu1 %1438, %v999_v41   ;;  %1046 = vperm.xlu0 %1439, %v1003_v30   ;;  %v1007_v55 = vadd.f32 %v996_v34, %v975_v43  ;;  %v1143_v41 = vsub.s32 %v1140_v32, %v1708_v27  ;;  %v1168_v30 = vadd.s32 4294967192, %v1711_v62 }
 0x41e   :  { %v985_v45 = vpop.xlane.xlu0 %984 }
 0x41f   :  { %1049 = vperm.xlu1 %1438, %v1004_v42   ;;  %v1012_v51 = vadd.f32 %v996_v34, %v985_v45  ;;  %v1150_v42 = vsub.s32 %v1147_v33, %v1708_v27 }
 0x422   :  { %v981_v49 = vpop.xlane.xlu0 %980 }
 0x423   :  { %1043 = vperm.xlu1 %1438, %v1002_v44   ;;  %v1010_v50 = vadd.f32 %v996_v34, %v981_v49  ;;  %v1164_v49 = vsub.s32 %v1161_v39, %v1708_v27 }
 0x426   :  { %v983_v54 = vpop.xlane.xlu0 %982 }
 0x427   :  { %1061 = vperm.xlu1 %1438, %v1008_v46   ;;  %v1011_v56 = vadd.f32 %v996_v34, %v983_v54  ;;  %v1171_v54 = vsub.s32 %v1168_v30, %v1708_v27 }
 0x42a   :  { %v987_v57 = vpop.xlane.xlu0 %986 }
 0x42b   :  { %1055 = vperm.xlu1 %1438, %v1006_v48   ;;  %v1013_v58 = vadd.f32 %v996_v34, %v987_v57  ;;  %v1157_v48 = vsub.s32 %v1154_v37, %v1708_v27 }
 0x42f   :  { %1067 = vperm.xlu1 %1438, %v1010_v50   ;;  %v1175_v50 = vadd.s32 4294967184, %v1711_v62 }
 0x433   :  { %1073 = vperm.xlu1 %1438, %v1012_v51  }
 0x43f   :  { %v979_v52 = vpop.xlane.xlu1 %978 }
 0x440   :  { %v1009_v53 = vadd.f32 %v996_v34, %v979_v52  ;;  %v1136_v34 = vsub.s32 %v1133_v23, %v1708_v27 }
 0x442   :  { %1064 = vperm.xlu0 %1439, %v1009_v53  }
 0x446   :  { %1058 = vperm.xlu0 %1439, %v1007_v55   ;;  %v1182_v55 = vadd.s32 4294967176, %v1711_v62 }
 0x44a   :  { %1070 = vperm.xlu0 %1439, %v1011_v56  }
 0x44e   :  { %1076 = vperm.xlu0 %1439, %v1013_v58  }
 0x48e   :  { %v1038_v47 = vpop.permute.xlu1 %1037  ;;  %v1032_v3 = vpop.permute.xlu0 %1031 }
 0x48f   :  { %v1083_v9 = vrot.slane %v1032_v3, %v1082_v4  ;;  %v1095_v15 = vrot.slane %v1038_v47, %v1094_v8  ;;  %v1185_v4 = vsub.s32 %v1182_v55, %v1708_v27 }
 0x492   :  { %v1041_v60 = vpop.permute.xlu1 %1040  ;;  %v1053_v10 = vpop.permute.xlu0 %1052 }
 0x493   :  { %v1102_v20 = vrot.slane %v1041_v60, %v1101_v12  ;;  %v1130_v45 = vrot.slane %v1053_v10, %v1129_v35 }
 0x496   :  { %v1035_v61 = vpop.permute.xlu1 %1034  ;;  %v1047_v22 = vpop.permute.xlu0 %1046 }
 0x497   :  { %v1088_v7 = vrot.slane %v1035_v61, %v1087_v1  ;;  %v1116_v29 = vrot.slane %v1047_v22, %v1115_v21  ;;  %v1178_v61 = vsub.s32 %v1175_v50, %v1708_v27 }
 0x499   :  { %v1090_v13 = vsel %vm1089_vm0, %v1088_v7, %v1083_v9 }
 0x49a   :  { %v1050_v0 = vpop.permute.xlu1 %1049  ;;  %v1097_v17 = vsel %vm1096_vm1, %v1095_v15, %v1090_v13 }
 0x49b   :  { %v1104_v25 = vsel %vm1103_vm2, %v1102_v20, %v1097_v17  ;;  %v1123_v38 = vrot.slane %v1050_v0, %v1122_v26 }
 0x49e   :  { %v1044_v59 = vpop.permute.xlu1 %1043 }
 0x49f   :  { %v1109_v19 = vrot.slane %v1044_v59, %v1108_v11 }
 0x4a1   :  { %v1111_v28 = vsel %vm1110_vm3, %v1109_v19, %v1104_v25 }
 0x4a2   :  { %v1062_v16 = vpop.permute.xlu1 %1061  ;;  %v1118_v36 = vsel %vm1117_vm4, %v1116_v29, %v1111_v28 }
 0x4a3   :  { %v1125_v43 = vsel %vm1124_vm5, %v1123_v38, %v1118_v36  ;;  %v1151_v56 = vrot.slane %v1062_v16, %v1150_v42 }
 0x4a4   :  { %v1132_v52 = vsel %vm1131_vm6, %v1130_v45, %v1125_v43 }
 0x4a6   :  { %v1056_v31 = vpop.permute.xlu1 %1055 }
 0x4a7   :  { %v1137_v44 = vrot.slane %v1056_v31, %v1136_v34 }
 0x4a9   :  { %v1139_v57 = vsel %vm1138_vm7, %v1137_v44, %v1132_v52 }
 0x4aa   :  { %v1068_v46 = vpop.permute.xlu1 %1067 }
 0x4ab   :  { %v1165_v60 = vrot.slane %v1068_v46, %v1164_v49 }
 0x4ae   :  { %v1074_v1 = vpop.permute.xlu1 %1073 }
 0x4af   :  { %v1179_v62 = vrot.slane %v1074_v1, %v1178_v61 }
 0x4bd   :  { %v1065_v40 = vpop.permute.xlu0 %1064 }
 0x4be   :  { %v1158_v58 = vrot.slane %v1065_v40, %v1157_v48 }
 0x4c1   :  { %v1059_v51 = vpop.permute.xlu0 %1058 }
 0x4c2   :  { %v1144_v53 = vrot.slane %v1059_v51, %v1143_v41 }
 0x4c4   :  { %v1146_v47 = vsel %vm1145_vm8, %v1144_v53, %v1139_v57 }
 0x4c5   :  { %v1153_v63 = vsel %vm1152_vm9, %v1151_v56, %v1146_v47  ;;  %v1071_v0 = vpop.permute.xlu0 %1070 }
 0x4c6   :  { %v1160_v2 = vsel %vm1159_vm10, %v1158_v58, %v1153_v63  ;;  %v1172_v3 = vrot.slane %v1071_v0, %v1171_v54 }
 0x4c7   :  { %v1167_v5 = vsel %vm1166_vm11, %v1165_v60, %v1160_v2 }
 0x4c8   :  { %v1174_v6 = vsel %vm1173_vm12, %v1172_v3, %v1167_v5 }
 0x4c9   :  { %v1077_v7 = vpop.permute.xlu0 %1076  ;;  %v1181_v8 = vsel %vm1180_vm13, %v1179_v62, %v1174_v6 }
 0x4ca   :  { %v1186_v59 = vrot.slane %v1077_v7, %v1185_v4 }
 0x4cc   :  { %v1188_v9 = vsel %vm1187_vm14, %v1186_v59, %v1181_v8 }
 0x4cd   :  { %1190 = vst [vmem:[%s1754_s6] sm:$0x1] %v1188_v9 }
 0x4ce   :  { %1195 = vsyncpa [#allocation3], 1 }
 0x4cf   :  { %1196 = vsyncpa [#allocation5], 1 }

// kernel: _forward.1
= control target key start
LH: loop header
LB: loop body
LE: loop exit
PB: predicated region body
PF: predicated region fallthrough
CT: control target
= control target key end

     0   :  { %11 = vsyncpa [#allocation3], 0  ;;  %s1748_s0 = inlined_call_operand.vmem [shape: bf16[128,128], index: 0, kind: input, shape index: {}]   ;;  %s1749_s1 = inlined_call_operand.vmem [shape: bf16[128,128], index: 1, kind: input, shape index: {}]   ;;  %s1750_s2 = inlined_call_operand.hbm [shape: bf16[128,128], index: 2, kind: input, shape index: {}]   ;;  %s1751_s3 = inlined_call_operand.hbm [shape: bf16[128,128], index: 3, kind: input, shape index: {}]   ;;  %s1752_s4 = inlined_call_operand.hbm [shape: bf16[128,128], index: 4, kind: input, shape index: {}]   ;;  %s1753_s5 = inlined_call_operand.vmem [shape: f32[8,128], index: 5, kind: input, shape index: {}]   ;;  %s1754_s6 = inlined_call_operand.vmem [shape: f32[1,1,128], index: 6, kind: output, shape index: {}]  }
   0x1   :  { %12 = vsyncpa [#allocation5], 0  ;;  %s1544_s21 = smov [#allocation4]   ;;  %s1545_s23 = smov [#allocation2]  }
   0x2   :  { %s34_s22 = sshll.u32 %s1544_s21, 4  ;;  %s22_s24 = sshll.u32 %s1545_s23, 4  ;;  %s35_s22 = int_to_ptr.vmem [resolvable:$true] %s34_s22  ;;  %s23_s24 = int_to_ptr.vmem [resolvable:$true] %s22_s24 }
   0x3   :  { %s1488_s25 = scalar_lea.vmem %s35_s22, 1024  ;;  %p1493_p1 = scmp.lt.s32.totalorder %s35_s22, %s35_s22 }
   0x4   :  { %p1489_p0 = scmp.ne.s32.totalorder %s35_s22, %s1488_s25  ;;  %p1494_p2 = scmp.lt.s32.totalorder %s1488_s25, %s1488_s25 }
   0x6   :  { %p1495_p3 = por %p1494_p2, %p1493_p1 }
   0x8   :  { %p1496_p4 = pnand %p1495_p3, %p1489_p0 }
   0xa   :  { %1499 = shalt.err (!%p1496_p4)
}
   0xb   :  { %s1546_s26 = smov 64   ;;  %s1547_s27 = smov 4  }
   0xc   :  { %40 = dma.hbm_to_vmem [thread:$0]  %s1751_s3, 1024, %s35_s22, [#allocation5], %s1546_s26, %s1546_s26, %s1547_s27  }
   0xd   :  { %s1508_s30 = scalar_lea.vmem %s23_s24, 1024  ;;  %p1513_p6 = scmp.lt.s32.totalorder %s23_s24, %s23_s24 }
   0xe   :  { %p1509_p5 = scmp.ne.s32.totalorder %s23_s24, %s1508_s30  ;;  %p1514_p7 = scmp.lt.s32.totalorder %s1508_s30, %s1508_s30 }
  0x10   :  { %p1515_p8 = por %p1514_p7, %p1513_p6 }
  0x12   :  { %p1516_p9 = pnand %p1515_p8, %p1509_p5 }
  0x14   :  { %1519 = shalt.err (!%p1516_p9)
}
  0x15   :  { %28 = dma.hbm_to_vmem [thread:$0]  %s1750_s2, 1024, %s23_s24, [#allocation3], %s1546_s26, %s1546_s26, %s1547_s27  }
  0x16   :  { %s1548_s9 = smov [#allocation6]  }
  0x17   :  { %s46_s10 = sshll.u32 %s1548_s9, 4  ;;  %s47_s10 = int_to_ptr.vmem [resolvable:$true] %s46_s10 }
  0x18   :  { %s1528_s11 = scalar_lea.vmem %s47_s10, 1024  ;;  %p1533_p11 = scmp.lt.s32.totalorder %s47_s10, %s47_s10 }
  0x19   :  { %p1529_p10 = scmp.ne.s32.totalorder %s47_s10, %s1528_s11  ;;  %p1534_p12 = scmp.lt.s32.totalorder %s1528_s11, %s1528_s11 }
  0x1b   :  { %p1535_p13 = por %p1534_p12, %p1533_p11 }
  0x1d   :  { %p1536_p0 = pnand %p1535_p13, %p1529_p10 }
  0x1f   :  { %1539 = shalt.err (!%p1536_p0)
}
  0x20   :  { %52 = dma.hbm_to_vmem [thread:$0]  %s1752_s4, 1024, %s47_s10, [#allocation5], %s1546_s26, %s1546_s26, %s1547_s27  }
  0x21   :  { %1540 = dma.done.wait [#allocation3], 1024  }
  0x22   :  { %1541 = vsyncadd [#allocation3], 4294966272 }
  0x23   :  { %1542 = dma.done.wait [#allocation5], 2048  }
  0x24   :  { %1543 = vsyncadd [#allocation5], 4294965248  ;;  %v1440_v0 = vld [vmem:[%s1749_s1 + $0x38] sm:$0xff]   ;;  %v1441_v1 = vld [vmem:[%s1749_s1 + $0x30] sm:$0xff]  }
  0x25   :  { %1304 = vmatprep.subr.bf16.mxu0 %v1440_v0  ;;  %v1442_v2 = vld [vmem:[%s1749_s1 + $0x28] sm:$0xff]   ;;  %v1443_v3 = vld [vmem:[%s1749_s1 + $0x20] sm:$0xff]   ;;  %v1444_v5 = vld [vmem:[%s1749_s1 + $0x18] sm:$0xff]  }
  0x26   :  { %1305 = vmatpush3.bf16.msra.mxu0 %v1440_v0  ;;  %v1448_v4 = vld [vmem:[%s1748_s0] sm:$0xff]   ;;  %v1445_v6 = vld [vmem:[%s1749_s1 + $0x10] sm:$0xff]   ;;  %v1456_v7 = vld [vmem:[#allocation2 + $0x38] sm:$0xff]  }
  0x27   :  { %1306 = vmatprep.subr.bf16.mxu0 %v1441_v1  ;;  %1320 = vmatprep.mubr.bf16.mxu0 %v1448_v4  ;;  %v1457_v8 = vld [vmem:[#allocation2 + $0x30] sm:$0xff]   ;;  %v1446_v9 = vld [vmem:[%s1749_s1 + $0x8] sm:$0xff]   ;;  %v1447_v11 = vld [vmem:[%s1749_s1] sm:$0xff]  }
  0x28   :  { %1336 = vmatprep.subr.bf16.mxu1 %v1456_v7  ;;  %v1458_v10 = vld [vmem:[#allocation2 + $0x28] sm:$0xff]   ;;  %v1459_v12 = vld [vmem:[#allocation2 + $0x20] sm:$0xff]   ;;  %v1460_v13 = vld [vmem:[#allocation2 + $0x18] sm:$0xff]  }
  0x29   :  { %1337 = vmatpush3.bf16.msra.mxu1 %v1456_v7  ;;  %v1449_v14 = vld [vmem:[%s1748_s0 + $0x8] sm:$0xff]   ;;  %v1450_v15 = vld [vmem:[%s1748_s0 + $0x10] sm:$0xff]   ;;  %v1451_v16 = vld [vmem:[%s1748_s0 + $0x18] sm:$0xff]  }
  0x2a   :  { %1307 = vmatpush3.bf16.msra.mxu0 %v1441_v1  ;;  %1338 = vmatprep.subr.bf16.mxu1 %v1457_v8  ;;  %v1452_v17 = vld [vmem:[%s1748_s0 + $0x20] sm:$0xff]   ;;  %v1453_v18 = vld [vmem:[%s1748_s0 + $0x28] sm:$0xff]   ;;  %v1454_v19 = vld [vmem:[%s1748_s0 + $0x30] sm:$0xff]  }
  0x2b   :  { %1308 = vmatprep.subr.bf16.mxu0 %v1442_v2  ;;  %v1455_v20 = vld [vmem:[%s1748_s0 + $0x38] sm:$0xff]   ;;  %v1461_v21 = vld [vmem:[#allocation2 + $0x10] sm:$0xff]   ;;  %v1462_v22 = vld [vmem:[#allocation2 + $0x8] sm:$0xff]  }
  0x2c   :  { %v1463_v23 = vld [vmem:[#allocation2] sm:$0xff]   ;;  %v1464_v24 = vld [vmem:[#allocation4 + $0x38] sm:$0xff]   ;;  %v1465_v25 = vld [vmem:[#allocation4 + $0x30] sm:$0xff]  }
  0x2d   :  { %1339 = vmatpush3.bf16.msra.mxu1 %v1457_v8  ;;  %v1466_v26 = vld [vmem:[#allocation4 + $0x28] sm:$0xff]   ;;  %v1467_v27 = vld [vmem:[#allocation4 + $0x20] sm:$0xff]   ;;  %v1468_v28 = vld [vmem:[#allocation4 + $0x18] sm:$0xff]  }
  0x2e   :  { %1309 = vmatpush3.bf16.msra.mxu0 %v1442_v2  ;;  %1340 = vmatprep.subr.bf16.mxu1 %v1458_v10  ;;  %v1645_v30 = vld [vmem:[%s1753_s5] ss:$0 sm:$0xff] }
  0x2f   :  { %1310 = vmatprep.subr.bf16.mxu0 %v1443_v3 }
  0x31   :  { %1341 = vmatpush3.bf16.msra.mxu1 %v1458_v10 }
  0x32   :  { %1311 = vmatpush3.bf16.msra.mxu0 %v1443_v3  ;;  %1342 = vmatprep.subr.bf16.mxu1 %v1459_v12 }
  0x33   :  { %1312 = vmatprep.subr.bf16.mxu0 %v1444_v5 }
  0x35   :  { %1343 = vmatpush3.bf16.msra.mxu1 %v1459_v12 }
  0x36   :  { %1313 = vmatpush3.bf16.msra.mxu0 %v1444_v5  ;;  %1344 = vmatprep.subr.bf16.mxu1 %v1460_v13 }
  0x37   :  { %1314 = vmatprep.subr.bf16.mxu0 %v1445_v6 }
  0x39   :  { %1345 = vmatpush3.bf16.msra.mxu1 %v1460_v13 }
  0x3a   :  { %1315 = vmatpush3.bf16.msra.mxu0 %v1445_v6  ;;  %1346 = vmatprep.subr.bf16.mxu1 %v1461_v21 }
  0x3b   :  { %1316 = vmatprep.subr.bf16.mxu0 %v1446_v9 }
  0x3d   :  { %1347 = vmatpush3.bf16.msra.mxu1 %v1461_v21 }
  0x3e   :  { %1317 = vmatpush3.bf16.msra.mxu0 %v1446_v9  ;;  %1348 = vmatprep.subr.bf16.mxu1 %v1462_v22 }
  0x3f   :  { %1318 = vmatprep.subr.bf16.mxu0 %v1447_v11 }
  0x41   :  { %1349 = vmatpush3.bf16.msra.mxu1 %v1462_v22 }
  0x42   :  { %1319 = vmatpush3.bf16.msra.mxu0 %v1447_v11  ;;  %1350 = vmatprep.subr.bf16.mxu1 %v1463_v23 }
  0x43   :  { %1368 = vmatprep.subr.bf16.mxu0 %v1464_v24 }
  0x45   :  { %1321 = vmatmul.mubr.bf16.vlgmr.msra.gmra.mxu0 %v1449_v14  ;;  %1351 = vmatpush3.bf16.msra.mxu1 %v1463_v23 }
  0x46   :  { %1324 = vmatprep.mubr.bf16.mxu0 %v1450_v15  ;;  %1369 = vmatpush3.bf16.msra.mxu0 %v1464_v24 }
  0x47   :  { %1370 = vmatprep.subr.bf16.mxu0 %v1465_v25 }
  0x4a   :  { %1371 = vmatpush3.bf16.msra.mxu0 %v1465_v25 }
  0x4b   :  { %1372 = vmatprep.subr.bf16.mxu0 %v1466_v26 }
  0x4d   :  { %1325 = vmatmul.mubr.bf16.gmra.mxu0 %v1451_v16 }
  0x4e   :  { %1328 = vmatprep.mubr.bf16.mxu0 %v1452_v17  ;;  %1373 = vmatpush3.bf16.msra.mxu0 %v1466_v26 }
  0x4f   :  { %1374 = vmatprep.subr.bf16.mxu0 %v1467_v27 }
  0x52   :  { %1375 = vmatpush3.bf16.msra.mxu0 %v1467_v27 }
  0x53   :  { %1376 = vmatprep.subr.bf16.mxu0 %v1468_v28 }
  0x55   :  { %1329 = vmatmul.mubr.bf16.gmra.mxu0 %v1453_v18 }
  0x56   :  { %1332 = vmatprep.mubr.bf16.mxu0 %v1454_v19  ;;  %1377 = vmatpush3.bf16.msra.mxu0 %v1468_v28 }
  0x5d   :  { %1333 = vmatmul.mubr.bf16.gmra.mxu0 %v1455_v20 }
 0x105   :  { %v1322_v29 = vpop.f32.mrf.mxu0 }
 0x106   :  { %v241_v33 = vadd.f32 %v1322_v29, %v1645_v30 }
 0x107   :  { %v232_v31 = vpop.f32.mrf.mxu0 }
 0x108   :  { %v233_v32 = vadd.f32 %v1645_v30, %v232_v31  ;;  %v313_v40 = vmul.f32 0.01, %v241_v33  ;;  %vm297_vm2 = vcmp.ge.f32.partialorder %v241_v33, 0.0 }
 0x109   :  { %v1323_v34 = vpop.f32.mrf.mxu0 }
 0x10a   :  { %v244_v35 = vadd.f32 %v1323_v34, %v1645_v30  ;;  %v311_v37 = vmul.f32 0.01, %v233_v32  ;;  %vm295_vm1 = vcmp.ge.f32.partialorder %v233_v32, 0.0  ;;  %v329_v51 = vsel %vm297_vm2, %v241_v33, %v313_v40  ;;  %v1470_v40 = vld [vmem:[#allocation4 + $0x8] sm:$0xff]  }
 0x10b   :  { %v235_v36 = vpop.f32.mrf.mxu0 }
 0x10c   :  { %vm298_vm0 = vcmp.ge.f32.partialorder %v244_v35, 0.0  ;;  %v314_v38 = vmul.f32 0.01, %v244_v35  ;;  %v236_v39 = vadd.f32 %v1645_v30, %v235_v36  ;;  %v327_v47 = vsel %vm295_vm1, %v233_v32, %v311_v37 }
 0x10d   :  { %v1326_v41 = vpop.f32.mrf.mxu0 }
 0x10e   :  { %v312_v42 = vmul.f32 0.01, %v236_v39  ;;  %vm296_vm3 = vcmp.ge.f32.partialorder %v236_v39, 0.0  ;;  %v257_v43 = vadd.f32 %v1326_v41, %v1645_v30  ;;  %v330_v45 = vsel %vm298_vm0, %v244_v35, %v314_v38  ;;  %v1471_v41 = vld [vmem:[#allocation4] sm:$0xff]  }
 0x10f   :  { %v248_v44 = vpop.f32.mrf.mxu0  ;;  %v344_v53 = vpack.c.bf16 %v330_v45, %v329_v51  ;;  %v1476_v45 = vld [vmem:[#allocation6 + $0x18] sm:$0xff]  }
 0x110   :  { %v249_v46 = vadd.f32 %v1645_v30, %v248_v44  ;;  %v328_v48 = vsel %vm296_vm3, %v236_v39, %v312_v42  ;;  %v317_v54 = vmul.f32 0.01, %v257_v43  ;;  %vm301_vm5 = vcmp.ge.f32.partialorder %v257_v43, 0.0  ;;  %v1469_v39 = vld [vmem:[#allocation4 + $0x10] sm:$0xff]   ;;  %v1475_v44 = vld [vmem:[#allocation6 + $0x20] sm:$0xff]  }
 0x111   :  { %v1327_v49 = vpop.f32.mrf.mxu0  ;;  %v343_v50 = vpack.c.bf16 %v328_v48, %v327_v47  ;;  %1378 = vmatprep.subr.bf16.mxu0 %v1469_v39  ;;  %v1473_v42 = vld [vmem:[#allocation6 + $0x30] sm:$0xff]   ;;  %v1666_v47 = vld [vmem:[%s1753_s5 + $0x1] ss:$0 sm:$0xff] }
 0x112   :  { %v260_v52 = vadd.f32 %v1327_v49, %v1645_v30  ;;  %v315_v56 = vmul.f32 0.01, %v249_v46  ;;  %vm299_vm6 = vcmp.ge.f32.partialorder %v249_v46, 0.0  ;;  %v333_v2 = vsel %vm301_vm5, %v257_v43, %v317_v54  ;;  %1379 = vmatpush3.bf16.msra.mxu0 %v1469_v39  ;;  %v1474_v43 = vld [vmem:[#allocation6 + $0x28] sm:$0xff]  }
 0x113   :  { %v251_v55 = vpop.f32.mrf.mxu0  ;;  %1352 = vmatprep.mubr.bf16.mxu1 %v343_v50  ;;  %1380 = vmatprep.subr.bf16.mxu0 %v1470_v40 }
 0x114   :  { %vm302_vm4 = vcmp.ge.f32.partialorder %v260_v52, 0.0  ;;  %v318_v57 = vmul.f32 0.01, %v260_v52  ;;  %v252_v58 = vadd.f32 %v1645_v30, %v251_v55  ;;  %1353 = vmatmul.mubr.bf16.vlgmr.msra.gmra.mxu1 %v344_v53  ;;  %v331_v0 = vsel %vm299_vm6, %v249_v46, %v315_v56 }
 0x115   :  { %v1330_v59 = vpop.f32.mrf.mxu0 }
 0x116   :  { %vm300_vm7 = vcmp.ge.f32.partialorder %v252_v58, 0.0  ;;  %v316_v60 = vmul.f32 0.01, %v252_v58  ;;  %v273_v61 = vadd.f32 %v1330_v59, %v1645_v30  ;;  %v334_v62 = vsel %vm302_vm4, %v260_v52, %v318_v57  ;;  %1381 = vmatpush3.bf16.msra.mxu0 %v1470_v40 }
 0x117   :  { %v264_v63 = vpop.f32.mrf.mxu0  ;;  %v346_v6 = vpack.c.bf16 %v334_v62, %v333_v2  ;;  %1382 = vmatprep.subr.bf16.mxu0 %v1471_v41 }
 0x118   :  { %v332_v1 = vsel %vm300_vm7, %v252_v58, %v316_v60  ;;  %v265_v3 = vadd.f32 %v1645_v30, %v264_v63  ;;  %v321_v4 = vmul.f32 0.01, %v273_v61  ;;  %vm305_vm8 = vcmp.ge.f32.partialorder %v273_v61, 0.0 }
 0x119   :  { %v345_v5 = vpack.c.bf16 %v332_v1, %v331_v0  ;;  %v1331_v7 = vpop.f32.mrf.mxu0 }
 0x11a   :  { %vm303_vm9 = vcmp.ge.f32.partialorder %v265_v3, 0.0  ;;  %v319_v8 = vmul.f32 0.01, %v265_v3  ;;  %v276_v9 = vadd.f32 %v1331_v7, %v1645_v30  ;;  %v337_v15 = vsel %vm305_vm8, %v273_v61, %v321_v4  ;;  %1383 = vmatpush3.bf16.msra.mxu0 %v1471_v41 }
 0x11b   :  { %1356 = vmatprep.mubr.bf16.mxu1 %v345_v5  ;;  %v267_v10 = vpop.f32.mrf.mxu0 }
 0x11c   :  { %1357 = vmatmul.mubr.bf16.gmra.mxu1 %v346_v6  ;;  %vm306_vm10 = vcmp.ge.f32.partialorder %v276_v9, 0.0  ;;  %v322_v11 = vmul.f32 0.01, %v276_v9  ;;  %v268_v12 = vadd.f32 %v1645_v30, %v267_v10  ;;  %v335_v14 = vsel %vm303_vm9, %v265_v3, %v319_v8 }
 0x11d   :  { %v1334_v13 = vpop.f32.mrf.mxu0 }
 0x11e   :  { %vm304_vm11 = vcmp.ge.f32.partialorder %v268_v12, 0.0  ;;  %v320_v16 = vmul.f32 0.01, %v268_v12  ;;  %v289_v17 = vadd.f32 %v1334_v13, %v1645_v30  ;;  %v338_v18 = vsel %vm306_vm10, %v276_v9, %v322_v11 }
 0x11f   :  { %v280_v19 = vpop.f32.mrf.mxu0  ;;  %v348_v22 = vpack.c.bf16 %v338_v18, %v337_v15 }
 0x120   :  { %v281_v20 = vadd.f32 %v1645_v30, %v280_v19  ;;  %v336_v21 = vsel %vm304_vm11, %v268_v12, %v320_v16  ;;  %v325_v23 = vmul.f32 0.01, %v289_v17  ;;  %vm309_vm12 = vcmp.ge.f32.partialorder %v289_v17, 0.0 }
 0x121   :  { %v347_v24 = vpack.c.bf16 %v336_v21, %v335_v14  ;;  %v1335_v25 = vpop.f32.mrf.mxu0 }
 0x122   :  { %v323_v26 = vmul.f32 0.01, %v281_v20  ;;  %v292_v27 = vadd.f32 %v1335_v25, %v1645_v30  ;;  %vm307_vm13 = vcmp.ge.f32.partialorder %v281_v20, 0.0  ;;  %v341_v32 = vsel %vm309_vm12, %v289_v17, %v325_v23 }
 0x123   :  { %1360 = vmatprep.mubr.bf16.mxu1 %v347_v24  ;;  %v283_v28 = vpop.f32.mrf.mxu0 }
 0x124   :  { %1361 = vmatmul.mubr.bf16.gmra.mxu1 %v348_v22  ;;  %vm310_vm14 = vcmp.ge.f32.partialorder %v292_v27, 0.0  ;;  %v326_v29 = vmul.f32 0.01, %v292_v27  ;;  %v284_v31 = vadd.f32 %v1645_v30, %v283_v28  ;;  %v339_v34 = vsel %vm307_vm13, %v281_v20, %v323_v26  ;;  %v1472_v30 = vld [vmem:[#allocation6 + $0x38] sm:$0xff]  }
 0x125   :  { %1400 = vmatprep.subr.bf16.mxu1 %v1472_v30 }
 0x126   :  { %vm308_vm15 = vcmp.ge.f32.partialorder %v284_v31, 0.0  ;;  %v324_v33 = vmul.f32 0.01, %v284_v31  ;;  %v342_v35 = vsel %vm310_vm14, %v292_v27, %v326_v29  ;;  %1401 = vmatpush3.bf16.msra.mxu1 %v1472_v30 }
 0x127   :  { %v350_v37 = vpack.c.bf16 %v342_v35, %v341_v32  ;;  %1402 = vmatprep.subr.bf16.mxu1 %v1473_v42 }
 0x128   :  { %v340_v36 = vsel %vm308_vm15, %v284_v31, %v324_v33 }
 0x129   :  { %v349_v38 = vpack.c.bf16 %v340_v36, %v339_v34 }
 0x12a   :  { %1403 = vmatpush3.bf16.msra.mxu1 %v1473_v42 }
 0x12b   :  { %1364 = vmatprep.mubr.bf16.mxu1 %v349_v38  ;;  %1404 = vmatprep.subr.bf16.mxu1 %v1474_v43 }
 0x12c   :  { %1365 = vmatmul.mubr.bf16.gmra.mxu1 %v350_v37 }
 0x12e   :  { %1405 = vmatpush3.bf16.msra.mxu1 %v1474_v43 }
 0x12f   :  { %1406 = vmatprep.subr.bf16.mxu1 %v1475_v44 }
 0x132   :  { %1407 = vmatpush3.bf16.msra.mxu1 %v1475_v44 }
 0x133   :  { %1408 = vmatprep.subr.bf16.mxu1 %v1476_v45 }
 0x136   :  { %1409 = vmatpush3.bf16.msra.mxu1 %v1476_v45 }
 0x1d4   :  { %v1354_v46 = vpop.f32.mrf.mxu1 }
 0x1d5   :  { %v463_v50 = vadd.f32 %v1354_v46, %v1666_v47 }
 0x1d6   :  { %v454_v48 = vpop.f32.mrf.mxu1 }
 0x1d7   :  { %v455_v49 = vadd.f32 %v1666_v47, %v454_v48  ;;  %v535_v57 = vmul.f32 0.01, %v463_v50  ;;  %vm519_vm2 = vcmp.ge.f32.partialorder %v463_v50, 0.0 }
 0x1d8   :  { %v1355_v51 = vpop.f32.mrf.mxu1 }
 0x1d9   :  { %v466_v52 = vadd.f32 %v1355_v51, %v1666_v47  ;;  %v533_v54 = vmul.f32 0.01, %v455_v49  ;;  %vm517_vm1 = vcmp.ge.f32.partialorder %v455_v49, 0.0  ;;  %v551_v2 = vsel %vm519_vm2, %v463_v50, %v535_v57  ;;  %v1478_v57 = vld [vmem:[#allocation6 + $0x8] sm:$0xff]  }
 0x1da   :  { %v457_v53 = vpop.f32.mrf.mxu1 }
 0x1db   :  { %vm520_vm0 = vcmp.ge.f32.partialorder %v466_v52, 0.0  ;;  %v536_v55 = vmul.f32 0.01, %v466_v52  ;;  %v458_v56 = vadd.f32 %v1666_v47, %v457_v53  ;;  %v549_v0 = vsel %vm517_vm1, %v455_v49, %v533_v54 }
 0x1dc   :  { %v1358_v58 = vpop.f32.mrf.mxu1 }
 0x1dd   :  { %vm518_vm3 = vcmp.ge.f32.partialorder %v458_v56, 0.0  ;;  %v534_v59 = vmul.f32 0.01, %v458_v56  ;;  %v552_v60 = vsel %vm520_vm0, %v466_v52, %v536_v55  ;;  %v479_v61 = vadd.f32 %v1358_v58, %v1666_v47  ;;  %v1479_v58 = vld [vmem:[#allocation6] sm:$0xff]  }
 0x1de   :  { %v470_v62 = vpop.f32.mrf.mxu1  ;;  %v566_v5 = vpack.c.bf16 %v552_v60, %v551_v2 }
 0x1df   :  { %v471_v63 = vadd.f32 %v1666_v47, %v470_v62  ;;  %v550_v1 = vsel %vm518_vm3, %v458_v56, %v534_v59  ;;  %v539_v7 = vmul.f32 0.01, %v479_v61  ;;  %vm523_vm5 = vcmp.ge.f32.partialorder %v479_v61, 0.0  ;;  %v1477_v56 = vld [vmem:[#allocation6 + $0x10] sm:$0xff]   ;;  %v1687_v59 = vld [vmem:[%s1753_s5 + $0x2] ss:$0 sm:$0xff] }
 0x1e0   :  { %v1359_v3 = vpop.f32.mrf.mxu1  ;;  %v565_v4 = vpack.c.bf16 %v550_v1, %v549_v0  ;;  %1410 = vmatprep.subr.bf16.mxu1 %v1477_v56 }
 0x1e1   :  { %v482_v6 = vadd.f32 %v1359_v3, %v1666_v47  ;;  %v537_v9 = vmul.f32 0.01, %v471_v63  ;;  %vm521_vm6 = vcmp.ge.f32.partialorder %v471_v63, 0.0  ;;  %v555_v19 = vsel %vm523_vm5, %v479_v61, %v539_v7  ;;  %1411 = vmatpush3.bf16.msra.mxu1 %v1477_v56 }
 0x1e2   :  { %v473_v8 = vpop.f32.mrf.mxu1  ;;  %1384 = vmatprep.mubr.bf16.mxu0 %v565_v4  ;;  %1412 = vmatprep.subr.bf16.mxu1 %v1478_v57 }
 0x1e3   :  { %vm524_vm4 = vcmp.ge.f32.partialorder %v482_v6, 0.0  ;;  %v540_v10 = vmul.f32 0.01, %v482_v6  ;;  %v474_v11 = vadd.f32 %v1666_v47, %v473_v8  ;;  %1385 = vmatmul.mubr.bf16.vlgmr.msra.gmra.mxu0 %v566_v5  ;;  %v553_v17 = vsel %vm521_vm6, %v471_v63, %v537_v9 }
 0x1e4   :  { %v1362_v12 = vpop.f32.mrf.mxu1 }
 0x1e5   :  { %vm522_vm7 = vcmp.ge.f32.partialorder %v474_v11, 0.0  ;;  %v538_v13 = vmul.f32 0.01, %v474_v11  ;;  %v495_v14 = vadd.f32 %v1362_v12, %v1666_v47  ;;  %v556_v15 = vsel %vm524_vm4, %v482_v6, %v540_v10  ;;  %1413 = vmatpush3.bf16.msra.mxu1 %v1478_v57 }
 0x1e6   :  { %v486_v16 = vpop.f32.mrf.mxu1  ;;  %v568_v23 = vpack.c.bf16 %v556_v15, %v555_v19  ;;  %1414 = vmatprep.subr.bf16.mxu1 %v1479_v58 }
 0x1e7   :  { %v554_v18 = vsel %vm522_vm7, %v474_v11, %v538_v13  ;;  %v487_v20 = vadd.f32 %v1666_v47, %v486_v16  ;;  %v543_v21 = vmul.f32 0.01, %v495_v14  ;;  %vm527_vm8 = vcmp.ge.f32.partialorder %v495_v14, 0.0 }
 0x1e8   :  { %v567_v22 = vpack.c.bf16 %v554_v18, %v553_v17  ;;  %v1363_v24 = vpop.f32.mrf.mxu1 }
 0x1e9   :  { %vm525_vm9 = vcmp.ge.f32.partialorder %v487_v20, 0.0  ;;  %v541_v25 = vmul.f32 0.01, %v487_v20  ;;  %v498_v26 = vadd.f32 %v1363_v24, %v1666_v47  ;;  %v559_v33 = vsel %vm527_vm8, %v495_v14, %v543_v21  ;;  %1415 = vmatpush3.bf16.msra.mxu1 %v1479_v58 }
 0x1ea   :  { %1388 = vmatprep.mubr.bf16.mxu0 %v567_v22  ;;  %v489_v27 = vpop.f32.mrf.mxu1 }
 0x1eb   :  { %1389 = vmatmul.mubr.bf16.gmra.mxu0 %v568_v23  ;;  %vm528_vm10 = vcmp.ge.f32.partialorder %v498_v26, 0.0  ;;  %v544_v28 = vmul.f32 0.01, %v498_v26  ;;  %v490_v29 = vadd.f32 %v1666_v47, %v489_v27  ;;  %v557_v32 = vsel %vm525_vm9, %v487_v20, %v541_v25 }
 0x1ec   :  { %v1366_v31 = vpop.f32.mrf.mxu1 }
 0x1ed   :  { %vm526_vm11 = vcmp.ge.f32.partialorder %v490_v29, 0.0  ;;  %v542_v34 = vmul.f32 0.01, %v490_v29  ;;  %v511_v35 = vadd.f32 %v1366_v31, %v1666_v47  ;;  %v560_v36 = vsel %vm528_vm10, %v498_v26, %v544_v28 }
 0x1ee   :  { %v502_v37 = vpop.f32.mrf.mxu1  ;;  %v570_v40 = vpack.c.bf16 %v560_v36, %v559_v33 }
 0x1ef   :  { %v503_v38 = vadd.f32 %v1666_v47, %v502_v37  ;;  %v558_v39 = vsel %vm526_vm11, %v490_v29, %v542_v34  ;;  %v547_v41 = vmul.f32 0.01, %v511_v35  ;;  %vm531_vm12 = vcmp.ge.f32.partialorder %v511_v35, 0.0 }
 0x1f0   :  { %v569_v30 = vpack.c.bf16 %v558_v39, %v557_v32  ;;  %v1367_v42 = vpop.f32.mrf.mxu1 }
 0x1f1   :  { %v545_v43 = vmul.f32 0.01, %v503_v38  ;;  %v514_v44 = vadd.f32 %v1367_v42, %v1666_v47  ;;  %vm529_vm13 = vcmp.ge.f32.partialorder %v503_v38, 0.0  ;;  %v563_v49 = vsel %vm531_vm12, %v511_v35, %v547_v41 }
 0x1f2   :  { %1392 = vmatprep.mubr.bf16.mxu0 %v569_v30  ;;  %v505_v45 = vpop.f32.mrf.mxu1 }
 0x1f3   :  { %1393 = vmatmul.mubr.bf16.gmra.mxu0 %v570_v40  ;;  %vm532_vm14 = vcmp.ge.f32.partialorder %v514_v44, 0.0  ;;  %v548_v46 = vmul.f32 0.01, %v514_v44  ;;  %v506_v48 = vadd.f32 %v1666_v47, %v505_v45  ;;  %v561_v51 = vsel %vm529_vm13, %v503_v38, %v545_v43 }
 0x1f5   :  { %vm530_vm15 = vcmp.ge.f32.partialorder %v506_v48, 0.0  ;;  %v546_v50 = vmul.f32 0.01, %v506_v48  ;;  %v564_v52 = vsel %vm532_vm14, %v514_v44, %v548_v46 }
 0x1f6   :  { %v572_v54 = vpack.c.bf16 %v564_v52, %v563_v49 }
 0x1f7   :  { %v562_v53 = vsel %vm530_vm15, %v506_v48, %v546_v50 }
 0x1f8   :  { %v571_v55 = vpack.c.bf16 %v562_v53, %v561_v51 }
 0x1fa   :  { %1396 = vmatprep.mubr.bf16.mxu0 %v571_v55 }
 0x1fb   :  { %1397 = vmatmul.mubr.bf16.gmra.mxu0 %v572_v54 }
 0x2a3   :  { %v1386_v47 = vpop.f32.mrf.mxu0 }
 0x2a4   :  { %v685_v62 = vadd.f32 %v1386_v47, %v1687_v59 }
 0x2a5   :  { %v676_v60 = vpop.f32.mrf.mxu0 }
 0x2a6   :  { %v677_v61 = vadd.f32 %v1687_v59, %v676_v60  ;;  %v757_v5 = vmul.f32 0.01, %v685_v62  ;;  %vm741_vm2 = vcmp.ge.f32.partialorder %v685_v62, 0.0 }
 0x2a7   :  { %v1387_v63 = vpop.f32.mrf.mxu0 }
 0x2a8   :  { %v688_v0 = vadd.f32 %v1387_v63, %v1687_v59  ;;  %v755_v2 = vmul.f32 0.01, %v677_v61  ;;  %vm739_vm1 = vcmp.ge.f32.partialorder %v677_v61, 0.0  ;;  %v773_v14 = vsel %vm741_vm2, %v685_v62, %v757_v5 }
 0x2a9   :  { %v679_v1 = vpop.f32.mrf.mxu0  ;;  %vm1103_vm2 = vcmask 261312  }
 0x2aa   :  { %vm742_vm0 = vcmp.ge.f32.partialorder %v688_v0, 0.0  ;;  %v758_v3 = vmul.f32 0.01, %v688_v0  ;;  %v680_v4 = vadd.f32 %v1687_v59, %v679_v1  ;;  %v771_v12 = vsel %vm739_vm1, %v677_v61, %v755_v2 }
 0x2ab   :  { %v1390_v6 = vpop.f32.mrf.mxu0  ;;  %vm1096_vm1 = vcmask 195712  }
 0x2ac   :  { %vm740_vm3 = vcmp.ge.f32.partialorder %v680_v4, 0.0  ;;  %v756_v7 = vmul.f32 0.01, %v680_v4  ;;  %v774_v8 = vsel %vm742_vm0, %v688_v0, %v758_v3  ;;  %v701_v9 = vadd.f32 %v1390_v6, %v1687_v59 }
 0x2ad   :  { %v692_v10 = vpop.f32.mrf.mxu0  ;;  %v788_v17 = vpack.c.bf16 %v774_v8, %v773_v14  ;;  %vm1089_vm0 = vcmask 130112  }
 0x2ae   :  { %v693_v11 = vadd.f32 %v1687_v59, %v692_v10  ;;  %v772_v13 = vsel %vm740_vm3, %v680_v4, %v756_v7  ;;  %v761_v19 = vmul.f32 0.01, %v701_v9  ;;  %vm745_vm5 = vcmp.ge.f32.partialorder %v701_v9, 0.0 }
 0x2af   :  { %v1391_v15 = vpop.f32.mrf.mxu0  ;;  %v787_v16 = vpack.c.bf16 %v772_v13, %v771_v12  ;;  %v1549_v4 = vmov 0   ;;  %vm1110_vm3 = vcmask 326912  }
 0x2b0   :  { %v704_v18 = vadd.f32 %v1391_v15, %v1687_v59  ;;  %v759_v21 = vmul.f32 0.01, %v693_v11  ;;  %vm743_vm6 = vcmp.ge.f32.partialorder %v693_v11, 0.0  ;;  %v777_v32 = vsel %vm745_vm5, %v701_v9, %v761_v19  ;;  %1438 = vset.pattern.permute.xlu1 %v1549_v4  ;;  %1439 = vset.pattern.permute.xlu0 %v1549_v4 }
 0x2b1   :  { %v695_v20 = vpop.f32.mrf.mxu0  ;;  %1416 = vmatprep.mubr.bf16.mxu1 %v787_v16  ;;  %v988_v16 = vld [vmem:[%s1753_s5 + $0x3] sm:$0x1]  ;;  %vm1124_vm5 = vcmask 458112  }
 0x2b2   :  { %vm746_vm4 = vcmp.ge.f32.partialorder %v704_v18, 0.0  ;;  %v762_v22 = vmul.f32 0.01, %v704_v18  ;;  %v696_v23 = vadd.f32 %v1687_v59, %v695_v20  ;;  %1417 = vmatmul.mubr.bf16.vlgmr.msra.gmra.mxu1 %v788_v17  ;;  %v775_v29 = vsel %vm743_vm6, %v693_v11, %v759_v21 }
 0x2b3   :  { %v1394_v24 = vpop.f32.mrf.mxu0  ;;  %vm1131_vm6 = vcmask 523712  }
 0x2b4   :  { %vm744_vm7 = vcmp.ge.f32.partialorder %v696_v23, 0.0  ;;  %v760_v25 = vmul.f32 0.01, %v696_v23  ;;  %v717_v26 = vadd.f32 %v1394_v24, %v1687_v59  ;;  %v778_v27 = vsel %vm746_vm4, %v704_v18, %v762_v22 }
 0x2b5   :  { %v708_v28 = vpop.f32.mrf.mxu0  ;;  %v790_v36 = vpack.c.bf16 %v778_v27, %v777_v32  ;;  %v993_v24 = vlaneseq  ;;  %vm1117_vm4 = vcmask 392512  }
 0x2b6   :  { %v776_v31 = vsel %vm744_vm7, %v696_v23, %v760_v25  ;;  %v709_v33 = vadd.f32 %v1687_v59, %v708_v28  ;;  %v765_v34 = vmul.f32 0.01, %v717_v26  ;;  %vm749_vm8 = vcmp.ge.f32.partialorder %v717_v26, 0.0 }
 0x2b7   :  { %v789_v35 = vpack.c.bf16 %v776_v31, %v775_v29  ;;  %v1395_v37 = vpop.f32.mrf.mxu0  ;;  %v1708_v27 = vshrl.u32 %v993_v24, 7  ;;  %vm1138_vm7 = vcmask 589312  }
 0x2b8   :  { %vm747_vm9 = vcmp.ge.f32.partialorder %v709_v33, 0.0  ;;  %v763_v38 = vmul.f32 0.01, %v709_v33  ;;  %v720_v39 = vadd.f32 %v1395_v37, %v1687_v59  ;;  %v781_v44 = vsel %vm749_vm8, %v717_v26, %v765_v34 }
 0x2b9   :  { %1420 = vmatprep.mubr.bf16.mxu1 %v789_v35  ;;  %v711_v40 = vpop.f32.mrf.mxu0  ;;  %v995_v31 = vsub.s32 0, %v1708_v27  ;;  %vm1145_vm8 = vcmask 654912  }
 0x2ba   :  { %1421 = vmatmul.mubr.bf16.gmra.mxu1 %v790_v36  ;;  %vm750_vm10 = vcmp.ge.f32.partialorder %v720_v39, 0.0  ;;  %v766_v41 = vmul.f32 0.01, %v720_v39  ;;  %v712_v30 = vadd.f32 %v1687_v59, %v711_v40  ;;  %v779_v43 = vsel %vm747_vm9, %v709_v33, %v763_v38 }
 0x2bb   :  { %v1398_v42 = vpop.f32.mrf.mxu0  ;;  %vm1152_vm9 = vcmask 720512  }
 0x2bc   :  { %vm748_vm11 = vcmp.ge.f32.partialorder %v712_v30, 0.0  ;;  %v764_v45 = vmul.f32 0.01, %v712_v30  ;;  %v733_v46 = vadd.f32 %v1398_v42, %v1687_v59  ;;  %v782_v48 = vsel %vm750_vm10, %v720_v39, %v766_v41 }
 0x2bd   :  { %v724_v49 = vpop.f32.mrf.mxu0  ;;  %v792_v52 = vpack.c.bf16 %v782_v48, %v781_v44  ;;  %vm1159_vm10 = vcmask 786112  }
 0x2be   :  { %v725_v50 = vadd.f32 %v1687_v59, %v724_v49  ;;  %v780_v51 = vsel %vm748_vm11, %v712_v30, %v764_v45  ;;  %v769_v53 = vmul.f32 0.01, %v733_v46  ;;  %vm753_vm12 = vcmp.ge.f32.partialorder %v733_v46, 0.0 }
 0x2bf   :  { %v791_v54 = vpack.c.bf16 %v780_v51, %v779_v43  ;;  %v1399_v55 = vpop.f32.mrf.mxu0  ;;  %vm1166_vm11 = vcmask 851712  }
 0x2c0   :  { %v767_v56 = vmul.f32 0.01, %v725_v50  ;;  %v736_v57 = vadd.f32 %v1399_v55, %v1687_v59  ;;  %vm751_vm13 = vcmp.ge.f32.partialorder %v725_v50, 0.0  ;;  %v785_v61 = vsel %vm753_vm12, %v733_v46, %v769_v53 }
 0x2c1   :  { %1424 = vmatprep.mubr.bf16.mxu1 %v791_v54  ;;  %v727_v58 = vpop.f32.mrf.mxu0  ;;  %vm1173_vm12 = vcmask 917312  }
 0x2c2   :  { %1425 = vmatmul.mubr.bf16.gmra.mxu1 %v792_v52  ;;  %vm754_vm14 = vcmp.ge.f32.partialorder %v736_v57, 0.0  ;;  %v770_v47 = vmul.f32 0.01, %v736_v57  ;;  %v728_v60 = vadd.f32 %v1687_v59, %v727_v58  ;;  %v783_v63 = vsel %vm751_vm13, %v725_v50, %v767_v56 }
 0x2c3   :  { %vm1180_vm13 = vcmask 982912  }
 0x2c4   :  { %vm752_vm15 = vcmp.ge.f32.partialorder %v728_v60, 0.0  ;;  %v768_v62 = vmul.f32 0.01, %v728_v60  ;;  %v786_v0 = vsel %vm754_vm14, %v736_v57, %v770_v47  ;;  %vm1187_vm14 = vcmask 1048512  }
 0x2c5   :  { %v794_v2 = vpack.c.bf16 %v786_v0, %v785_v61 }
 0x2c6   :  { %v784_v1 = vsel %vm752_vm15, %v728_v60, %v768_v62  ;;  %v1711_v62 = vand.u32 127, %v993_v24 }
 0x2c7   :  { %v793_v3 = vpack.c.bf16 %v784_v1, %v783_v63 }
 0x2c8   :  { %v1084_v63 = vadd.s32 4294967288, %v1711_v62  ;;  %v1082_v4 = vsub.s32 %v1711_v62, %v1708_v27  ;;  %v1126_v24 = vadd.s32 4294967240, %v1711_v62 }
 0x2c9   :  { %1428 = vmatprep.mubr.bf16.mxu1 %v793_v3 }
 0x2ca   :  { %1429 = vmatmul.mubr.bf16.gmra.mxu1 %v794_v2  ;;  %v1087_v1 = vsub.s32 %v1084_v63, %v1708_v27  ;;  %v1091_v2 = vadd.s32 4294967280, %v1711_v62 }
 0x372   :  { %v1418_v5 = vpop.f32.mrf.mxu1 }
 0x373   :  { %960 = vadd.xlane.f32.xlu1 %v1418_v5  ;;  %v1105_v5 = vadd.s32 4294967264, %v1711_v62 }
 0x374   :  { %v893_v6 = vpop.f32.mrf.mxu1 }
 0x375   :  { %956 = vadd.xlane.f32.xlu0 %v893_v6  ;;  %v1098_v6 = vadd.s32 4294967272, %v1711_v62 }
 0x376   :  { %v1419_v7 = vpop.f32.mrf.mxu1 }
 0x377   :  { %962 = vadd.xlane.f32.xlu1 %v1419_v7 }
 0x378   :  { %v896_v59 = vpop.f32.mrf.mxu1 }
 0x379   :  { %958 = vadd.xlane.f32.xlu0 %v896_v59 }
 0x37a   :  { %v1422_v8 = vpop.f32.mrf.mxu1 }
 0x37c   :  { %v909_v9 = vpop.f32.mrf.mxu1 }
 0x37d   :  { %968 = vadd.xlane.f32.xlu0 %v1422_v8  ;;  %v1094_v8 = vsub.s32 %v1091_v2, %v1708_v27 }
 0x37e   :  { %v1423_v10 = vpop.f32.mrf.mxu1 }
 0x380   :  { %v912_v11 = vpop.f32.mrf.mxu1 }
 0x381   :  { %964 = vadd.xlane.f32.xlu0 %v909_v9  ;;  %966 = vadd.xlane.f32.xlu1 %v912_v11  ;;  %v1108_v11 = vsub.s32 %v1105_v5, %v1708_v27 }
 0x382   :  { %v1426_v12 = vpop.f32.mrf.mxu1 }
 0x384   :  { %v925_v13 = vpop.f32.mrf.mxu1 }
 0x385   :  { %970 = vadd.xlane.f32.xlu0 %v1423_v10 }
 0x386   :  { %v1427_v14 = vpop.f32.mrf.mxu1 }
 0x388   :  { %v928_v15 = vpop.f32.mrf.mxu1 }
 0x389   :  { %976 = vadd.xlane.f32.xlu0 %v1426_v12  ;;  %v1101_v12 = vsub.s32 %v1098_v6, %v1708_v27 }
 0x38a   :  { %v1430_v17 = vpop.f32.mrf.mxu1 }
 0x38c   :  { %v941_v18 = vpop.f32.mrf.mxu1 }
 0x38d   :  { %972 = vadd.xlane.f32.xlu0 %v925_v13 }
 0x38e   :  { %v1431_v19 = vpop.f32.mrf.mxu1 }
 0x390   :  { %v944_v20 = vpop.f32.mrf.mxu1 }
 0x391   :  { %974 = vadd.xlane.f32.xlu0 %v928_v15 }
 0x392   :  { %991 = vperm.xlu1 %1438, %v988_v16  }
 0x395   :  { %984 = vadd.xlane.f32.xlu0 %v1430_v17 }
 0x399   :  { %980 = vadd.xlane.f32.xlu0 %v941_v18  ;;  %v1119_v18 = vadd.s32 4294967248, %v1711_v62 }
 0x39d   :  { %982 = vadd.xlane.f32.xlu0 %v944_v20 }
 0x3a1   :  { %986 = vadd.xlane.f32.xlu0 %v1431_v19 }
 0x3b6   :  { %978 = vadd.xlane.f32.xlu1 %v1427_v14  ;;  %v1112_v14 = vadd.s32 4294967256, %v1711_v62 }
 0x3fc   :  { %v961_v22 = vpop.xlane.xlu1 %960 }
 0x3fe   :  { %v957_v21 = vpop.xlane.xlu0 %956 }
 0x400   :  { %v963_v25 = vpop.xlane.xlu1 %962 }
 0x402   :  { %v959_v23 = vpop.xlane.xlu0 %958 }
 0x406   :  { %v969_v26 = vpop.xlane.xlu0 %968 }
 0x40a   :  { %v965_v28 = vpop.xlane.xlu0 %964  ;;  %v967_v29 = vpop.xlane.xlu1 %966 }
 0x40e   :  { %v971_v32 = vpop.xlane.xlu0 %970  ;;  %v992_v33 = vpop.permute.xlu1 %991 }
 0x40f   :  { %v996_v34 = vrot.slane %v992_v33, %v995_v31  ;;  %v1147_v33 = vadd.s32 4294967216, %v1711_v62 }
 0x411   :  { %v1000_v35 = vadd.f32 %v996_v34, %v961_v22  ;;  %v998_v36 = vadd.f32 %v996_v34, %v957_v21  ;;  %v1001_v38 = vadd.f32 %v996_v34, %v963_v25  ;;  %v1005_v39 = vadd.f32 %v996_v34, %v971_v32 }
 0x412   :  { %v977_v37 = vpop.xlane.xlu0 %976  ;;  %v999_v41 = vadd.f32 %v996_v34, %v959_v23  ;;  %v1003_v30 = vadd.f32 %v996_v34, %v967_v29  ;;  %v1004_v42 = vadd.f32 %v996_v34, %v969_v26  ;;  %v1002_v44 = vadd.f32 %v996_v34, %v965_v28 }
 0x413   :  { %1037 = vperm.xlu1 %1438, %v1000_v35   ;;  %1031 = vperm.xlu0 %1439, %v998_v36   ;;  %v1008_v46 = vadd.f32 %v996_v34, %v977_v37  ;;  %v1115_v21 = vsub.s32 %v1112_v14, %v1708_v27  ;;  %v1133_v23 = vadd.s32 4294967232, %v1711_v62  ;;  %v1122_v26 = vsub.s32 %v1119_v18, %v1708_v27 }
 0x414   :  { %v1140_v32 = vadd.s32 4294967224, %v1711_v62  ;;  %v1129_v35 = vsub.s32 %v1126_v24, %v1708_v27  ;;  %v1154_v37 = vadd.s32 4294967208, %v1711_v62 }
 0x416   :  { %v973_v40 = vpop.xlane.xlu0 %972 }
 0x417   :  { %1040 = vperm.xlu1 %1438, %v1001_v38   ;;  %1052 = vperm.xlu0 %1439, %v1005_v39   ;;  %v1006_v48 = vadd.f32 %v996_v34, %v973_v40  ;;  %v1161_v39 = vadd.s32 4294967200, %v1711_v62 }
 0x41a   :  { %v975_v43 = vpop.xlane.xlu0 %974 }
 0x41b   :  { %1034 = vperm.xlu1 %1438, %v999_v41   ;;  %1046 = vperm.xlu0 %1439, %v1003_v30   ;;  %v1007_v55 = vadd.f32 %v996_v34, %v975_v43  ;;  %v1143_v41 = vsub.s32 %v1140_v32, %v1708_v27  ;;  %v1168_v30 = vadd.s32 4294967192, %v1711_v62 }
 0x41e   :  { %v985_v45 = vpop.xlane.xlu0 %984 }
 0x41f   :  { %1049 = vperm.xlu1 %1438, %v1004_v42   ;;  %v1012_v51 = vadd.f32 %v996_v34, %v985_v45  ;;  %v1150_v42 = vsub.s32 %v1147_v33, %v1708_v27 }
 0x422   :  { %v981_v49 = vpop.xlane.xlu0 %980 }
 0x423   :  { %1043 = vperm.xlu1 %1438, %v1002_v44   ;;  %v1010_v50 = vadd.f32 %v996_v34, %v981_v49  ;;  %v1164_v49 = vsub.s32 %v1161_v39, %v1708_v27 }
 0x426   :  { %v983_v54 = vpop.xlane.xlu0 %982 }
 0x427   :  { %1061 = vperm.xlu1 %1438, %v1008_v46   ;;  %v1011_v56 = vadd.f32 %v996_v34, %v983_v54  ;;  %v1171_v54 = vsub.s32 %v1168_v30, %v1708_v27 }
 0x42a   :  { %v987_v57 = vpop.xlane.xlu0 %986 }
 0x42b   :  { %1055 = vperm.xlu1 %1438, %v1006_v48   ;;  %v1013_v58 = vadd.f32 %v996_v34, %v987_v57  ;;  %v1157_v48 = vsub.s32 %v1154_v37, %v1708_v27 }
 0x42f   :  { %1067 = vperm.xlu1 %1438, %v1010_v50   ;;  %v1175_v50 = vadd.s32 4294967184, %v1711_v62 }
 0x433   :  { %1073 = vperm.xlu1 %1438, %v1012_v51  }
 0x43f   :  { %v979_v52 = vpop.xlane.xlu1 %978 }
 0x440   :  { %v1009_v53 = vadd.f32 %v996_v34, %v979_v52  ;;  %v1136_v34 = vsub.s32 %v1133_v23, %v1708_v27 }
 0x442   :  { %1064 = vperm.xlu0 %1439, %v1009_v53  }
 0x446   :  { %1058 = vperm.xlu0 %1439, %v1007_v55   ;;  %v1182_v55 = vadd.s32 4294967176, %v1711_v62 }
 0x44a   :  { %1070 = vperm.xlu0 %1439, %v1011_v56  }
 0x44e   :  { %1076 = vperm.xlu0 %1439, %v1013_v58  }
 0x48e   :  { %v1038_v47 = vpop.permute.xlu1 %1037  ;;  %v1032_v3 = vpop.permute.xlu0 %1031 }
 0x48f   :  { %v1083_v9 = vrot.slane %v1032_v3, %v1082_v4  ;;  %v1095_v15 = vrot.slane %v1038_v47, %v1094_v8  ;;  %v1185_v4 = vsub.s32 %v1182_v55, %v1708_v27 }
 0x492   :  { %v1041_v60 = vpop.permute.xlu1 %1040  ;;  %v1053_v10 = vpop.permute.xlu0 %1052 }
 0x493   :  { %v1102_v20 = vrot.slane %v1041_v60, %v1101_v12  ;;  %v1130_v45 = vrot.slane %v1053_v10, %v1129_v35 }
 0x496   :  { %v1035_v61 = vpop.permute.xlu1 %1034  ;;  %v1047_v22 = vpop.permute.xlu0 %1046 }
 0x497   :  { %v1088_v7 = vrot.slane %v1035_v61, %v1087_v1  ;;  %v1116_v29 = vrot.slane %v1047_v22, %v1115_v21  ;;  %v1178_v61 = vsub.s32 %v1175_v50, %v1708_v27 }
 0x499   :  { %v1090_v13 = vsel %vm1089_vm0, %v1088_v7, %v1083_v9 }
 0x49a   :  { %v1050_v0 = vpop.permute.xlu1 %1049  ;;  %v1097_v17 = vsel %vm1096_vm1, %v1095_v15, %v1090_v13 }
 0x49b   :  { %v1104_v25 = vsel %vm1103_vm2, %v1102_v20, %v1097_v17  ;;  %v1123_v38 = vrot.slane %v1050_v0, %v1122_v26 }
 0x49e   :  { %v1044_v59 = vpop.permute.xlu1 %1043 }
 0x49f   :  { %v1109_v19 = vrot.slane %v1044_v59, %v1108_v11 }
 0x4a1   :  { %v1111_v28 = vsel %vm1110_vm3, %v1109_v19, %v1104_v25 }
 0x4a2   :  { %v1062_v16 = vpop.permute.xlu1 %1061  ;;  %v1118_v36 = vsel %vm1117_vm4, %v1116_v29, %v1111_v28 }
 0x4a3   :  { %v1125_v43 = vsel %vm1124_vm5, %v1123_v38, %v1118_v36  ;;  %v1151_v56 = vrot.slane %v1062_v16, %v1150_v42 }
 0x4a4   :  { %v1132_v52 = vsel %vm1131_vm6, %v1130_v45, %v1125_v43 }
 0x4a6   :  { %v1056_v31 = vpop.permute.xlu1 %1055 }
 0x4a7   :  { %v1137_v44 = vrot.slane %v1056_v31, %v1136_v34 }
 0x4a9   :  { %v1139_v57 = vsel %vm1138_vm7, %v1137_v44, %v1132_v52 }
 0x4aa   :  { %v1068_v46 = vpop.permute.xlu1 %1067 }
 0x4ab   :  { %v1165_v60 = vrot.slane %v1068_v46, %v1164_v49 }
 0x4ae   :  { %v1074_v1 = vpop.permute.xlu1 %1073 }
 0x4af   :  { %v1179_v62 = vrot.slane %v1074_v1, %v1178_v61 }
 0x4bd   :  { %v1065_v40 = vpop.permute.xlu0 %1064 }
 0x4be   :  { %v1158_v58 = vrot.slane %v1065_v40, %v1157_v48 }
 0x4c1   :  { %v1059_v51 = vpop.permute.xlu0 %1058 }
 0x4c2   :  { %v1144_v53 = vrot.slane %v1059_v51, %v1143_v41 }
 0x4c4   :  { %v1146_v47 = vsel %vm1145_vm8, %v1144_v53, %v1139_v57 }
 0x4c5   :  { %v1153_v63 = vsel %vm1152_vm9, %v1151_v56, %v1146_v47  ;;  %v1071_v0 = vpop.permute.xlu0 %1070 }
 0x4c6   :  { %v1160_v2 = vsel %vm1159_vm10, %v1158_v58, %v1153_v63  ;;  %v1172_v3 = vrot.slane %v1071_v0, %v1171_v54 }
 0x4c7   :  { %v1167_v5 = vsel %vm1166_vm11, %v1165_v60, %v1160_v2 }
 0x4c8   :  { %v1174_v6 = vsel %vm1173_vm12, %v1172_v3, %v1167_v5 }
 0x4c9   :  { %v1077_v7 = vpop.permute.xlu0 %1076  ;;  %v1181_v8 = vsel %vm1180_vm13, %v1179_v62, %v1174_v6 }
 0x4ca   :  { %v1186_v59 = vrot.slane %v1077_v7, %v1185_v4 }
 0x4cc   :  { %v1188_v9 = vsel %vm1187_vm14, %v1186_v59, %v1181_v8 }
 0x4cd   :  { %1190 = vst [vmem:[%s1754_s6] sm:$0x1] %v1188_v9 }
 0x4ce   :  { %1195 = vsyncpa [#allocation3], 1 }
 0x4cf   :  { %1196 = vsyncpa [#allocation5], 1 }

</bundles_post_ra>
